<compile_context>
chip_gen: v7x
topology: tpu7x:2x2x1
jax: 0.10.0
libtpu: 0.0.40
codegen_flags: <defaults>
</compile_context>

<pallas_src>
import jax
import jax.numpy as jnp
from jax import lax
from jax.experimental import pallas as pl
from jax.experimental.pallas import tpu as pltpu

DH = 50        # hidden size (dh)
DW = 300       # embedding dim (dw)
NCLASS = 4
VOCAB = 64     # stand-in for len(dict) + 1

DH_P = 128     # hidden dim padded to one full lane register
NC_P = 128     # class dim padded to one full lane register
BB = 8         # batch block (sublane multiple); per-grid-step batch tile


def rnn_kernel(ids_ref, table_ref, whh_ref, wlin_ref, blin_ref, out_ref):
    """One batch block of the fused forward pass.

    ids_ref   : SMEM (T, B_P) int32   -- token ids, time-major (scalar prefetch)
    table_ref : VMEM (VOCAB, DH_P)    -- emb @ W_ih^T + (b_ih + b_hh), zero-padded
    whh_ref   : VMEM (DH_P, DH_P)     -- W_hh^T, zero-padded
    wlin_ref  : VMEM (DH_P, NC_P)     -- W_lin^T, zero-padded
    blin_ref  : VMEM (1, NC_P)        -- b_lin, padded lanes hold -1e30
    out_ref   : VMEM (BB, NC_P)       -- softmax probs (padded lanes ~ 0)
    """
    T = ids_ref.shape[0]
    bstart = pl.program_id(0) * BB

    whh = whh_ref[...]                                   # resident across timesteps
    h0 = jnp.zeros((BB, DH_P), jnp.float32)

    def step(t, h):
        # Fused embedding + input-projection gather: one (1, DH_P) row per batch element.
        rows = [table_ref[pl.ds(ids_ref[t, bstart + b], 1), :] for b in range(BB)]
        xt = jnp.concatenate(rows, axis=0)               # (BB, DH_P)
        return jnp.tanh(xt + jnp.dot(h, whh, preferred_element_type=jnp.float32))

    # T is small and static: fully unroll the serial recurrence.
    h_last = lax.fori_loop(0, T, step, h0, unroll=True)  # (BB, DH_P)

    logits = (jnp.dot(h_last, wlin_ref[...], preferred_element_type=jnp.float32)
              + blin_ref[...])                           # (BB, NC_P); pad lanes = -1e30
    m = jnp.max(logits, axis=-1, keepdims=True)
    e = jnp.exp(logits - m)                              # padded lanes underflow to 0
    s = jnp.sum(e, axis=-1, keepdims=True)
    inv = pl.reciprocal(s, approx=True)                  # EUP slot
    inv = inv * (2.0 - s * inv)                          # one Newton step -> f32 accuracy
    out_ref[...] = e * inv


def _round_up(x, m):
    return (x + m - 1) // m * m


@jax.jit
def rnn_forward(x_ids, params):
    """x_ids: (B, T) int32 token ids -> (B, NCLASS) softmax probs."""
    emb, w_ih, w_hh, b_ih, b_hh, w_lin, b_lin = params
    B, T = x_ids.shape
    B_P = _round_up(B, BB)

    # Fold input projection + both RNN biases into the embedding table (exact algebra).
    table = emb.astype(jnp.float32) @ w_ih.T.astype(jnp.float32) + (b_ih + b_hh)  # (VOCAB, DH)
    table_pad = jnp.zeros((VOCAB, DH_P), jnp.float32).at[:, :DH].set(table)

    # Lane-dense, zero-padded weights (padding columns/rows stay exactly 0 through tanh).
    whh_pad = jnp.zeros((DH_P, DH_P), jnp.float32).at[:DH, :DH].set(w_hh.T.astype(jnp.float32))
    wlin_pad = jnp.zeros((DH_P, NC_P), jnp.float32).at[:DH, :NCLASS].set(w_lin.T.astype(jnp.float32))
    blin_pad = (jnp.full((1, NC_P), -1e30, jnp.float32)
                .at[0, :NCLASS].set(b_lin.astype(jnp.float32)))

    # Ids padded on batch (token-0 rows are discarded) and laid out time-major.
    ids_pad = jnp.zeros((B_P, T), jnp.int32).at[:B, :].set(x_ids.astype(jnp.int32))
    ids_tm = ids_pad.T                                   # (T, B_P)

    grid_spec = pltpu.PrefetchScalarGridSpec(
        num_scalar_prefetch=1,                           # ids -> SMEM
        grid=(B_P // BB,),                               # batch blocks (parallel / 2-TC path)
        in_specs=[
            pl.BlockSpec((VOCAB, DH_P), lambda i, ids: (0, 0)),
            pl.BlockSpec((DH_P, DH_P), lambda i, ids: (0, 0)),
            pl.BlockSpec((DH_P, NC_P), lambda i, ids: (0, 0)),
            pl.BlockSpec((1, NC_P), lambda i, ids: (0, 0)),
        ],
        out_specs=pl.BlockSpec((BB, NC_P), lambda i, ids: (i, 0)),
    )

    out_pad = pl.pallas_call(
        rnn_kernel,
        out_shape=jax.ShapeDtypeStruct((B_P, NC_P), jnp.float32),
        grid_spec=grid_spec,
        compiler_params=pltpu.CompilerParams(dimension_semantics=("parallel",)),
    )(ids_tm, table_pad, whh_pad, wlin_pad, blin_pad)

    return out_pad[:B, :NCLASS]


def reference_forward(x_ids, params):
    emb, w_ih, w_hh, b_ih, b_hh, w_lin, b_lin = params
    x = jnp.take(emb, x_ids, axis=0)                     # (B, T, DW)
    B, T, _ = x.shape
    h = jnp.zeros((B, DH), jnp.float32)
    for t in range(T):
        h = jnp.tanh(x[:, t, :] @ w_ih.T + h @ w_hh.T + b_ih + b_hh)
    logits = h @ w_lin.T + b_lin
    return jax.nn.softmax(logits, axis=-1)


def init_params(key):
    ks = jax.random.split(key, 7)
    emb = jax.random.normal(ks[0], (VOCAB, DW), jnp.float32)
    s_rnn = 1.0 / jnp.sqrt(DH)
    w_ih = jax.random.uniform(ks[1], (DH, DW), jnp.float32, -s_rnn, s_rnn)
    w_hh = jax.random.uniform(ks[2], (DH, DH), jnp.float32, -s_rnn, s_rnn)
    b_ih = jax.random.uniform(ks[3], (DH,), jnp.float32, -s_rnn, s_rnn)
    b_hh = jax.random.uniform(ks[4], (DH,), jnp.float32, -s_rnn, s_rnn)
    s_lin = 1.0 / jnp.sqrt(DH)
    w_lin = jax.random.uniform(ks[5], (NCLASS, DH), jnp.float32, -s_lin, s_lin)
    b_lin = jax.random.uniform(ks[6], (NCLASS,), jnp.float32, -s_lin, s_lin)
    return emb, w_ih, w_hh, b_ih, b_hh, w_lin, b_lin


if __name__ == "__main__":
    key = jax.random.PRNGKey(0)
    params = init_params(key)

    B, T = 2, 8
    x_ids = jax.random.randint(jax.random.PRNGKey(1), (B, T), 0, VOCAB, jnp.int32)

    y = rnn_forward(x_ids, params)
    jax.block_until_ready(y)

    y_ref = reference_forward(x_ids, params)
    assert y.shape == (B, NCLASS)
    assert jnp.allclose(y, y_ref, rtol=1e-4, atol=1e-4), "mismatch vs JAX reference"
    assert jnp.allclose(jnp.sum(y, axis=-1), 1.0, atol=1e-4)

    print("KERNEL_OK")
</pallas_src>

<mosaic_0001>
module attributes {stable_mosaic.version = 11 : i64} {
  func.func @rnn_kernel(%arg0: i32, %arg1: memref<8x8xi32, #tpu.memory_space<smem>>, %arg2: memref<64x128xf32, #tpu.memory_space<vmem>>, %arg3: memref<128x128xf32, #tpu.memory_space<vmem>>, %arg4: memref<128x128xf32, #tpu.memory_space<vmem>>, %arg5: memref<1x128xf32, #tpu.memory_space<vmem>>, %arg6: memref<8x128xf32, #tpu.memory_space<vmem>>) attributes {dimension_semantics = [#tpu.dimension_semantics<parallel>], iteration_bounds = array<i64: 1>, scalar_prefetch = 1 : i64, scratch_operands = 0 : i64, tpu.core_type = #tpu.core_type<tc>, window_params = [{pipeline_mode = #tpu.pipeline_mode<synchronous>, transform_indices = @transform_0, window_bounds = array<i64: 64, 128>}, {pipeline_mode = #tpu.pipeline_mode<synchronous>, transform_indices = @transform_1, window_bounds = array<i64: 128, 128>}, {pipeline_mode = #tpu.pipeline_mode<synchronous>, transform_indices = @transform_2, window_bounds = array<i64: 128, 128>}, {pipeline_mode = #tpu.pipeline_mode<synchronous>, transform_indices = @transform_3, window_bounds = array<i64: 1, 128>}, {transform_indices = @transform_4, window_bounds = array<i64: 8, 128>}]} {
    %c8_i32 = arith.constant 8 : i32
    %0 = arith.muli %arg0, %c8_i32 : i32
    %c0 = arith.constant 0 : index
    %c0_0 = arith.constant 0 : index
    %1 = vector.load %arg3[%c0, %c0_0] : memref<128x128xf32, #tpu.memory_space<vmem>>, vector<128x128xf32>
    %cst = arith.constant 0.000000e+00 : f32
    %2 = vector.broadcast %cst : f32 to vector<8x128xf32>
    %c0_i32 = arith.constant 0 : i32
    %c0_i32_1 = arith.constant 0 : i32
    %3 = arith.addi %0, %c0_i32_1 : i32
    %4 = arith.index_cast %c0_i32 : i32 to index
    %5 = arith.index_cast %3 : i32 to index
    %6 = memref.load %arg1[%4, %5] : memref<8x8xi32, #tpu.memory_space<smem>>
    %7 = arith.index_cast %6 : i32 to index
    %c0_2 = arith.constant 0 : index
    %8 = vector.load %arg2[%7, %c0_2] : memref<64x128xf32, #tpu.memory_space<vmem>>, vector<1x128xf32>
    %c1_i32 = arith.constant 1 : i32
    %9 = arith.addi %0, %c1_i32 : i32
    %10 = arith.index_cast %c0_i32 : i32 to index
    %11 = arith.index_cast %9 : i32 to index
    %12 = memref.load %arg1[%10, %11] : memref<8x8xi32, #tpu.memory_space<smem>>
    %13 = arith.index_cast %12 : i32 to index
    %c0_3 = arith.constant 0 : index
    %14 = vector.load %arg2[%13, %c0_3] : memref<64x128xf32, #tpu.memory_space<vmem>>, vector<1x128xf32>
    %c2_i32 = arith.constant 2 : i32
    %15 = arith.addi %0, %c2_i32 : i32
    %16 = arith.index_cast %c0_i32 : i32 to index
    %17 = arith.index_cast %15 : i32 to index
    %18 = memref.load %arg1[%16, %17] : memref<8x8xi32, #tpu.memory_space<smem>>
    %19 = arith.index_cast %18 : i32 to index
    %c0_4 = arith.constant 0 : index
    %20 = vector.load %arg2[%19, %c0_4] : memref<64x128xf32, #tpu.memory_space<vmem>>, vector<1x128xf32>
    %c3_i32 = arith.constant 3 : i32
    %21 = arith.addi %0, %c3_i32 : i32
    %22 = arith.index_cast %c0_i32 : i32 to index
    %23 = arith.index_cast %21 : i32 to index
    %24 = memref.load %arg1[%22, %23] : memref<8x8xi32, #tpu.memory_space<smem>>
    %25 = arith.index_cast %24 : i32 to index
    %c0_5 = arith.constant 0 : index
    %26 = vector.load %arg2[%25, %c0_5] : memref<64x128xf32, #tpu.memory_space<vmem>>, vector<1x128xf32>
    %c4_i32 = arith.constant 4 : i32
    %27 = arith.addi %0, %c4_i32 : i32
    %28 = arith.index_cast %c0_i32 : i32 to index
    %29 = arith.index_cast %27 : i32 to index
    %30 = memref.load %arg1[%28, %29] : memref<8x8xi32, #tpu.memory_space<smem>>
    %31 = arith.index_cast %30 : i32 to index
    %c0_6 = arith.constant 0 : index
    %32 = vector.load %arg2[%31, %c0_6] : memref<64x128xf32, #tpu.memory_space<vmem>>, vector<1x128xf32>
    %c5_i32 = arith.constant 5 : i32
    %33 = arith.addi %0, %c5_i32 : i32
    %34 = arith.index_cast %c0_i32 : i32 to index
    %35 = arith.index_cast %33 : i32 to index
    %36 = memref.load %arg1[%34, %35] : memref<8x8xi32, #tpu.memory_space<smem>>
    %37 = arith.index_cast %36 : i32 to index
    %c0_7 = arith.constant 0 : index
    %38 = vector.load %arg2[%37, %c0_7] : memref<64x128xf32, #tpu.memory_space<vmem>>, vector<1x128xf32>
    %c6_i32 = arith.constant 6 : i32
    %39 = arith.addi %0, %c6_i32 : i32
    %40 = arith.index_cast %c0_i32 : i32 to index
    %41 = arith.index_cast %39 : i32 to index
    %42 = memref.load %arg1[%40, %41] : memref<8x8xi32, #tpu.memory_space<smem>>
    %43 = arith.index_cast %42 : i32 to index
    %c0_8 = arith.constant 0 : index
    %44 = vector.load %arg2[%43, %c0_8] : memref<64x128xf32, #tpu.memory_space<vmem>>, vector<1x128xf32>
    %c7_i32 = arith.constant 7 : i32
    %45 = arith.addi %0, %c7_i32 : i32
    %46 = arith.index_cast %c0_i32 : i32 to index
    %47 = arith.index_cast %45 : i32 to index
    %48 = memref.load %arg1[%46, %47] : memref<8x8xi32, #tpu.memory_space<smem>>
    %49 = arith.index_cast %48 : i32 to index
    %c0_9 = arith.constant 0 : index
    %50 = vector.load %arg2[%49, %c0_9] : memref<64x128xf32, #tpu.memory_space<vmem>>, vector<1x128xf32>
    %51 = tpu.concatenate %8, %14, %20, %26, %32, %38, %44, %50 in 0 : vector<1x128xf32>, vector<1x128xf32>, vector<1x128xf32>, vector<1x128xf32>, vector<1x128xf32>, vector<1x128xf32>, vector<1x128xf32>, vector<1x128xf32> -> vector<8x128xf32>
    %cst_10 = arith.constant dense<0.000000e+00> : vector<8x128xf32>
    %52 = tpu.matmul %2, %1, %cst_10 {dimension_numbers = #tpu.dot_dimension_numbers<[1], [0], [0], [1], [0, 0, 1, 1], [], []>} : vector<8x128xf32>, vector<128x128xf32>, vector<8x128xf32> -> vector<8x128xf32>
    %53 = arith.addf %51, %52 : vector<8x128xf32>
    %54 = math.tanh %53 : vector<8x128xf32>
    %c1_i32_11 = arith.constant 1 : i32
    %c0_i32_12 = arith.constant 0 : i32
    %55 = arith.addi %0, %c0_i32_12 : i32
    %56 = arith.index_cast %c1_i32_11 : i32 to index
    %57 = arith.index_cast %55 : i32 to index
    %58 = memref.load %arg1[%56, %57] : memref<8x8xi32, #tpu.memory_space<smem>>
    %59 = arith.index_cast %58 : i32 to index
    %c0_13 = arith.constant 0 : index
    %60 = vector.load %arg2[%59, %c0_13] : memref<64x128xf32, #tpu.memory_space<vmem>>, vector<1x128xf32>
    %c1_i32_14 = arith.constant 1 : i32
    %61 = arith.addi %0, %c1_i32_14 : i32
    %62 = arith.index_cast %c1_i32_11 : i32 to index
    %63 = arith.index_cast %61 : i32 to index
    %64 = memref.load %arg1[%62, %63] : memref<8x8xi32, #tpu.memory_space<smem>>
    %65 = arith.index_cast %64 : i32 to index
    %c0_15 = arith.constant 0 : index
    %66 = vector.load %arg2[%65, %c0_15] : memref<64x128xf32, #tpu.memory_space<vmem>>, vector<1x128xf32>
    %c2_i32_16 = arith.constant 2 : i32
    %67 = arith.addi %0, %c2_i32_16 : i32
    %68 = arith.index_cast %c1_i32_11 : i32 to index
    %69 = arith.index_cast %67 : i32 to index
    %70 = memref.load %arg1[%68, %69] : memref<8x8xi32, #tpu.memory_space<smem>>
    %71 = arith.index_cast %70 : i32 to index
    %c0_17 = arith.constant 0 : index
    %72 = vector.load %arg2[%71, %c0_17] : memref<64x128xf32, #tpu.memory_space<vmem>>, vector<1x128xf32>
    %c3_i32_18 = arith.constant 3 : i32
    %73 = arith.addi %0, %c3_i32_18 : i32
    %74 = arith.index_cast %c1_i32_11 : i32 to index
    %75 = arith.index_cast %73 : i32 to index
    %76 = memref.load %arg1[%74, %75] : memref<8x8xi32, #tpu.memory_space<smem>>
    %77 = arith.index_cast %76 : i32 to index
    %c0_19 = arith.constant 0 : index
    %78 = vector.load %arg2[%77, %c0_19] : memref<64x128xf32, #tpu.memory_space<vmem>>, vector<1x128xf32>
    %c4_i32_20 = arith.constant 4 : i32
    %79 = arith.addi %0, %c4_i32_20 : i32
    %80 = arith.index_cast %c1_i32_11 : i32 to index
    %81 = arith.index_cast %79 : i32 to index
    %82 = memref.load %arg1[%80, %81] : memref<8x8xi32, #tpu.memory_space<smem>>
    %83 = arith.index_cast %82 : i32 to index
    %c0_21 = arith.constant 0 : index
    %84 = vector.load %arg2[%83, %c0_21] : memref<64x128xf32, #tpu.memory_space<vmem>>, vector<1x128xf32>
    %c5_i32_22 = arith.constant 5 : i32
    %85 = arith.addi %0, %c5_i32_22 : i32
    %86 = arith.index_cast %c1_i32_11 : i32 to index
    %87 = arith.index_cast %85 : i32 to index
    %88 = memref.load %arg1[%86, %87] : memref<8x8xi32, #tpu.memory_space<smem>>
    %89 = arith.index_cast %88 : i32 to index
    %c0_23 = arith.constant 0 : index
    %90 = vector.load %arg2[%89, %c0_23] : memref<64x128xf32, #tpu.memory_space<vmem>>, vector<1x128xf32>
    %c6_i32_24 = arith.constant 6 : i32
    %91 = arith.addi %0, %c6_i32_24 : i32
    %92 = arith.index_cast %c1_i32_11 : i32 to index
    %93 = arith.index_cast %91 : i32 to index
    %94 = memref.load %arg1[%92, %93] : memref<8x8xi32, #tpu.memory_space<smem>>
    %95 = arith.index_cast %94 : i32 to index
    %c0_25 = arith.constant 0 : index
    %96 = vector.load %arg2[%95, %c0_25] : memref<64x128xf32, #tpu.memory_space<vmem>>, vector<1x128xf32>
    %c7_i32_26 = arith.constant 7 : i32
    %97 = arith.addi %0, %c7_i32_26 : i32
    %98 = arith.index_cast %c1_i32_11 : i32 to index
    %99 = arith.index_cast %97 : i32 to index
    %100 = memref.load %arg1[%98, %99] : memref<8x8xi32, #tpu.memory_space<smem>>
    %101 = arith.index_cast %100 : i32 to index
    %c0_27 = arith.constant 0 : index
    %102 = vector.load %arg2[%101, %c0_27] : memref<64x128xf32, #tpu.memory_space<vmem>>, vector<1x128xf32>
    %103 = tpu.concatenate %60, %66, %72, %78, %84, %90, %96, %102 in 0 : vector<1x128xf32>, vector<1x128xf32>, vector<1x128xf32>, vector<1x128xf32>, vector<1x128xf32>, vector<1x128xf32>, vector<1x128xf32>, vector<1x128xf32> -> vector<8x128xf32>
    %cst_28 = arith.constant dense<0.000000e+00> : vector<8x128xf32>
    %104 = tpu.matmul %54, %1, %cst_28 {dimension_numbers = #tpu.dot_dimension_numbers<[1], [0], [0], [1], [0, 0, 1, 1], [], []>} : vector<8x128xf32>, vector<128x128xf32>, vector<8x128xf32> -> vector<8x128xf32>
    %105 = arith.addf %103, %104 : vector<8x128xf32>
    %106 = math.tanh %105 : vector<8x128xf32>
    %c2_i32_29 = arith.constant 2 : i32
    %c0_i32_30 = arith.constant 0 : i32
    %107 = arith.addi %0, %c0_i32_30 : i32
    %108 = arith.index_cast %c2_i32_29 : i32 to index
    %109 = arith.index_cast %107 : i32 to index
    %110 = memref.load %arg1[%108, %109] : memref<8x8xi32, #tpu.memory_space<smem>>
    %111 = arith.index_cast %110 : i32 to index
    %c0_31 = arith.constant 0 : index
    %112 = vector.load %arg2[%111, %c0_31] : memref<64x128xf32, #tpu.memory_space<vmem>>, vector<1x128xf32>
    %c1_i32_32 = arith.constant 1 : i32
    %113 = arith.addi %0, %c1_i32_32 : i32
    %114 = arith.index_cast %c2_i32_29 : i32 to index
    %115 = arith.index_cast %113 : i32 to index
    %116 = memref.load %arg1[%114, %115] : memref<8x8xi32, #tpu.memory_space<smem>>
    %117 = arith.index_cast %116 : i32 to index
    %c0_33 = arith.constant 0 : index
    %118 = vector.load %arg2[%117, %c0_33] : memref<64x128xf32, #tpu.memory_space<vmem>>, vector<1x128xf32>
    %c2_i32_34 = arith.constant 2 : i32
    %119 = arith.addi %0, %c2_i32_34 : i32
    %120 = arith.index_cast %c2_i32_29 : i32 to index
    %121 = arith.index_cast %119 : i32 to index
    %122 = memref.load %arg1[%120, %121] : memref<8x8xi32, #tpu.memory_space<smem>>
    %123 = arith.index_cast %122 : i32 to index
    %c0_35 = arith.constant 0 : index
    %124 = vector.load %arg2[%123, %c0_35] : memref<64x128xf32, #tpu.memory_space<vmem>>, vector<1x128xf32>
    %c3_i32_36 = arith.constant 3 : i32
    %125 = arith.addi %0, %c3_i32_36 : i32
    %126 = arith.index_cast %c2_i32_29 : i32 to index
    %127 = arith.index_cast %125 : i32 to index
    %128 = memref.load %arg1[%126, %127] : memref<8x8xi32, #tpu.memory_space<smem>>
    %129 = arith.index_cast %128 : i32 to index
    %c0_37 = arith.constant 0 : index
    %130 = vector.load %arg2[%129, %c0_37] : memref<64x128xf32, #tpu.memory_space<vmem>>, vector<1x128xf32>
    %c4_i32_38 = arith.constant 4 : i32
    %131 = arith.addi %0, %c4_i32_38 : i32
    %132 = arith.index_cast %c2_i32_29 : i32 to index
    %133 = arith.index_cast %131 : i32 to index
    %134 = memref.load %arg1[%132, %133] : memref<8x8xi32, #tpu.memory_space<smem>>
    %135 = arith.index_cast %134 : i32 to index
    %c0_39 = arith.constant 0 : index
    %136 = vector.load %arg2[%135, %c0_39] : memref<64x128xf32, #tpu.memory_space<vmem>>, vector<1x128xf32>
    %c5_i32_40 = arith.constant 5 : i32
    %137 = arith.addi %0, %c5_i32_40 : i32
    %138 = arith.index_cast %c2_i32_29 : i32 to index
    %139 = arith.index_cast %137 : i32 to index
    %140 = memref.load %arg1[%138, %139] : memref<8x8xi32, #tpu.memory_space<smem>>
    %141 = arith.index_cast %140 : i32 to index
    %c0_41 = arith.constant 0 : index
    %142 = vector.load %arg2[%141, %c0_41] : memref<64x128xf32, #tpu.memory_space<vmem>>, vector<1x128xf32>
    %c6_i32_42 = arith.constant 6 : i32
    %143 = arith.addi %0, %c6_i32_42 : i32
    %144 = arith.index_cast %c2_i32_29 : i32 to index
    %145 = arith.index_cast %143 : i32 to index
    %146 = memref.load %arg1[%144, %145] : memref<8x8xi32, #tpu.memory_space<smem>>
    %147 = arith.index_cast %146 : i32 to index
    %c0_43 = arith.constant 0 : index
    %148 = vector.load %arg2[%147, %c0_43] : memref<64x128xf32, #tpu.memory_space<vmem>>, vector<1x128xf32>
    %c7_i32_44 = arith.constant 7 : i32
    %149 = arith.addi %0, %c7_i32_44 : i32
    %150 = arith.index_cast %c2_i32_29 : i32 to index
    %151 = arith.index_cast %149 : i32 to index
    %152 = memref.load %arg1[%150, %151] : memref<8x8xi32, #tpu.memory_space<smem>>
    %153 = arith.index_cast %152 : i32 to index
    %c0_45 = arith.constant 0 : index
    %154 = vector.load %arg2[%153, %c0_45] : memref<64x128xf32, #tpu.memory_space<vmem>>, vector<1x128xf32>
    %155 = tpu.concatenate %112, %118, %124, %130, %136, %142, %148, %154 in 0 : vector<1x128xf32>, vector<1x128xf32>, vector<1x128xf32>, vector<1x128xf32>, vector<1x128xf32>, vector<1x128xf32>, vector<1x128xf32>, vector<1x128xf32> -> vector<8x128xf32>
    %cst_46 = arith.constant dense<0.000000e+00> : vector<8x128xf32>
    %156 = tpu.matmul %106, %1, %cst_46 {dimension_numbers = #tpu.dot_dimension_numbers<[1], [0], [0], [1], [0, 0, 1, 1], [], []>} : vector<8x128xf32>, vector<128x128xf32>, vector<8x128xf32> -> vector<8x128xf32>
    %157 = arith.addf %155, %156 : vector<8x128xf32>
    %158 = math.tanh %157 : vector<8x128xf32>
    %c3_i32_47 = arith.constant 3 : i32
    %c0_i32_48 = arith.constant 0 : i32
    %159 = arith.addi %0, %c0_i32_48 : i32
    %160 = arith.index_cast %c3_i32_47 : i32 to index
    %161 = arith.index_cast %159 : i32 to index
    %162 = memref.load %arg1[%160, %161] : memref<8x8xi32, #tpu.memory_space<smem>>
    %163 = arith.index_cast %162 : i32 to index
    %c0_49 = arith.constant 0 : index
    %164 = vector.load %arg2[%163, %c0_49] : memref<64x128xf32, #tpu.memory_space<vmem>>, vector<1x128xf32>
    %c1_i32_50 = arith.constant 1 : i32
    %165 = arith.addi %0, %c1_i32_50 : i32
    %166 = arith.index_cast %c3_i32_47 : i32 to index
    %167 = arith.index_cast %165 : i32 to index
    %168 = memref.load %arg1[%166, %167] : memref<8x8xi32, #tpu.memory_space<smem>>
    %169 = arith.index_cast %168 : i32 to index
    %c0_51 = arith.constant 0 : index
    %170 = vector.load %arg2[%169, %c0_51] : memref<64x128xf32, #tpu.memory_space<vmem>>, vector<1x128xf32>
    %c2_i32_52 = arith.constant 2 : i32
    %171 = arith.addi %0, %c2_i32_52 : i32
    %172 = arith.index_cast %c3_i32_47 : i32 to index
    %173 = arith.index_cast %171 : i32 to index
    %174 = memref.load %arg1[%172, %173] : memref<8x8xi32, #tpu.memory_space<smem>>
    %175 = arith.index_cast %174 : i32 to index
    %c0_53 = arith.constant 0 : index
    %176 = vector.load %arg2[%175, %c0_53] : memref<64x128xf32, #tpu.memory_space<vmem>>, vector<1x128xf32>
    %c3_i32_54 = arith.constant 3 : i32
    %177 = arith.addi %0, %c3_i32_54 : i32
    %178 = arith.index_cast %c3_i32_47 : i32 to index
    %179 = arith.index_cast %177 : i32 to index
    %180 = memref.load %arg1[%178, %179] : memref<8x8xi32, #tpu.memory_space<smem>>
    %181 = arith.index_cast %180 : i32 to index
    %c0_55 = arith.constant 0 : index
    %182 = vector.load %arg2[%181, %c0_55] : memref<64x128xf32, #tpu.memory_space<vmem>>, vector<1x128xf32>
    %c4_i32_56 = arith.constant 4 : i32
    %183 = arith.addi %0, %c4_i32_56 : i32
    %184 = arith.index_cast %c3_i32_47 : i32 to index
    %185 = arith.index_cast %183 : i32 to index
    %186 = memref.load %arg1[%184, %185] : memref<8x8xi32, #tpu.memory_space<smem>>
    %187 = arith.index_cast %186 : i32 to index
    %c0_57 = arith.constant 0 : index
    %188 = vector.load %arg2[%187, %c0_57] : memref<64x128xf32, #tpu.memory_space<vmem>>, vector<1x128xf32>
    %c5_i32_58 = arith.constant 5 : i32
    %189 = arith.addi %0, %c5_i32_58 : i32
    %190 = arith.index_cast %c3_i32_47 : i32 to index
    %191 = arith.index_cast %189 : i32 to index
    %192 = memref.load %arg1[%190, %191] : memref<8x8xi32, #tpu.memory_space<smem>>
    %193 = arith.index_cast %192 : i32 to index
    %c0_59 = arith.constant 0 : index
    %194 = vector.load %arg2[%193, %c0_59] : memref<64x128xf32, #tpu.memory_space<vmem>>, vector<1x128xf32>
    %c6_i32_60 = arith.constant 6 : i32
    %195 = arith.addi %0, %c6_i32_60 : i32
    %196 = arith.index_cast %c3_i32_47 : i32 to index
    %197 = arith.index_cast %195 : i32 to index
    %198 = memref.load %arg1[%196, %197] : memref<8x8xi32, #tpu.memory_space<smem>>
    %199 = arith.index_cast %198 : i32 to index
    %c0_61 = arith.constant 0 : index
    %200 = vector.load %arg2[%199, %c0_61] : memref<64x128xf32, #tpu.memory_space<vmem>>, vector<1x128xf32>
    %c7_i32_62 = arith.constant 7 : i32
    %201 = arith.addi %0, %c7_i32_62 : i32
    %202 = arith.index_cast %c3_i32_47 : i32 to index
    %203 = arith.index_cast %201 : i32 to index
    %204 = memref.load %arg1[%202, %203] : memref<8x8xi32, #tpu.memory_space<smem>>
    %205 = arith.index_cast %204 : i32 to index
    %c0_63 = arith.constant 0 : index
    %206 = vector.load %arg2[%205, %c0_63] : memref<64x128xf32, #tpu.memory_space<vmem>>, vector<1x128xf32>
    %207 = tpu.concatenate %164, %170, %176, %182, %188, %194, %200, %206 in 0 : vector<1x128xf32>, vector<1x128xf32>, vector<1x128xf32>, vector<1x128xf32>, vector<1x128xf32>, vector<1x128xf32>, vector<1x128xf32>, vector<1x128xf32> -> vector<8x128xf32>
    %cst_64 = arith.constant dense<0.000000e+00> : vector<8x128xf32>
    %208 = tpu.matmul %158, %1, %cst_64 {dimension_numbers = #tpu.dot_dimension_numbers<[1], [0], [0], [1], [0, 0, 1, 1], [], []>} : vector<8x128xf32>, vector<128x128xf32>, vector<8x128xf32> -> vector<8x128xf32>
    %209 = arith.addf %207, %208 : vector<8x128xf32>
    %210 = math.tanh %209 : vector<8x128xf32>
    %c4_i32_65 = arith.constant 4 : i32
    %c0_i32_66 = arith.constant 0 : i32
    %211 = arith.addi %0, %c0_i32_66 : i32
    %212 = arith.index_cast %c4_i32_65 : i32 to index
    %213 = arith.index_cast %211 : i32 to index
    %214 = memref.load %arg1[%212, %213] : memref<8x8xi32, #tpu.memory_space<smem>>
    %215 = arith.index_cast %214 : i32 to index
    %c0_67 = arith.constant 0 : index
    %216 = vector.load %arg2[%215, %c0_67] : memref<64x128xf32, #tpu.memory_space<vmem>>, vector<1x128xf32>
    %c1_i32_68 = arith.constant 1 : i32
    %217 = arith.addi %0, %c1_i32_68 : i32
    %218 = arith.index_cast %c4_i32_65 : i32 to index
    %219 = arith.index_cast %217 : i32 to index
    %220 = memref.load %arg1[%218, %219] : memref<8x8xi32, #tpu.memory_space<smem>>
    %221 = arith.index_cast %220 : i32 to index
    %c0_69 = arith.constant 0 : index
    %222 = vector.load %arg2[%221, %c0_69] : memref<64x128xf32, #tpu.memory_space<vmem>>, vector<1x128xf32>
    %c2_i32_70 = arith.constant 2 : i32
    %223 = arith.addi %0, %c2_i32_70 : i32
    %224 = arith.index_cast %c4_i32_65 : i32 to index
    %225 = arith.index_cast %223 : i32 to index
    %226 = memref.load %arg1[%224, %225] : memref<8x8xi32, #tpu.memory_space<smem>>
    %227 = arith.index_cast %226 : i32 to index
    %c0_71 = arith.constant 0 : index
    %228 = vector.load %arg2[%227, %c0_71] : memref<64x128xf32, #tpu.memory_space<vmem>>, vector<1x128xf32>
    %c3_i32_72 = arith.constant 3 : i32
    %229 = arith.addi %0, %c3_i32_72 : i32
    %230 = arith.index_cast %c4_i32_65 : i32 to index
    %231 = arith.index_cast %229 : i32 to index
    %232 = memref.load %arg1[%230, %231] : memref<8x8xi32, #tpu.memory_space<smem>>
    %233 = arith.index_cast %232 : i32 to index
    %c0_73 = arith.constant 0 : index
    %234 = vector.load %arg2[%233, %c0_73] : memref<64x128xf32, #tpu.memory_space<vmem>>, vector<1x128xf32>
    %c4_i32_74 = arith.constant 4 : i32
    %235 = arith.addi %0, %c4_i32_74 : i32
    %236 = arith.index_cast %c4_i32_65 : i32 to index
    %237 = arith.index_cast %235 : i32 to index
    %238 = memref.load %arg1[%236, %237] : memref<8x8xi32, #tpu.memory_space<smem>>
    %239 = arith.index_cast %238 : i32 to index
    %c0_75 = arith.constant 0 : index
    %240 = vector.load %arg2[%239, %c0_75] : memref<64x128xf32, #tpu.memory_space<vmem>>, vector<1x128xf32>
    %c5_i32_76 = arith.constant 5 : i32
    %241 = arith.addi %0, %c5_i32_76 : i32
    %242 = arith.index_cast %c4_i32_65 : i32 to index
    %243 = arith.index_cast %241 : i32 to index
    %244 = memref.load %arg1[%242, %243] : memref<8x8xi32, #tpu.memory_space<smem>>
    %245 = arith.index_cast %244 : i32 to index
    %c0_77 = arith.constant 0 : index
    %246 = vector.load %arg2[%245, %c0_77] : memref<64x128xf32, #tpu.memory_space<vmem>>, vector<1x128xf32>
    %c6_i32_78 = arith.constant 6 : i32
    %247 = arith.addi %0, %c6_i32_78 : i32
    %248 = arith.index_cast %c4_i32_65 : i32 to index
    %249 = arith.index_cast %247 : i32 to index
    %250 = memref.load %arg1[%248, %249] : memref<8x8xi32, #tpu.memory_space<smem>>
    %251 = arith.index_cast %250 : i32 to index
    %c0_79 = arith.constant 0 : index
    %252 = vector.load %arg2[%251, %c0_79] : memref<64x128xf32, #tpu.memory_space<vmem>>, vector<1x128xf32>
    %c7_i32_80 = arith.constant 7 : i32
    %253 = arith.addi %0, %c7_i32_80 : i32
    %254 = arith.index_cast %c4_i32_65 : i32 to index
    %255 = arith.index_cast %253 : i32 to index
    %256 = memref.load %arg1[%254, %255] : memref<8x8xi32, #tpu.memory_space<smem>>
    %257 = arith.index_cast %256 : i32 to index
    %c0_81 = arith.constant 0 : index
    %258 = vector.load %arg2[%257, %c0_81] : memref<64x128xf32, #tpu.memory_space<vmem>>, vector<1x128xf32>
    %259 = tpu.concatenate %216, %222, %228, %234, %240, %246, %252, %258 in 0 : vector<1x128xf32>, vector<1x128xf32>, vector<1x128xf32>, vector<1x128xf32>, vector<1x128xf32>, vector<1x128xf32>, vector<1x128xf32>, vector<1x128xf32> -> vector<8x128xf32>
    %cst_82 = arith.constant dense<0.000000e+00> : vector<8x128xf32>
    %260 = tpu.matmul %210, %1, %cst_82 {dimension_numbers = #tpu.dot_dimension_numbers<[1], [0], [0], [1], [0, 0, 1, 1], [], []>} : vector<8x128xf32>, vector<128x128xf32>, vector<8x128xf32> -> vector<8x128xf32>
    %261 = arith.addf %259, %260 : vector<8x128xf32>
    %262 = math.tanh %261 : vector<8x128xf32>
    %c5_i32_83 = arith.constant 5 : i32
    %c0_i32_84 = arith.constant 0 : i32
    %263 = arith.addi %0, %c0_i32_84 : i32
    %264 = arith.index_cast %c5_i32_83 : i32 to index
    %265 = arith.index_cast %263 : i32 to index
    %266 = memref.load %arg1[%264, %265] : memref<8x8xi32, #tpu.memory_space<smem>>
    %267 = arith.index_cast %266 : i32 to index
    %c0_85 = arith.constant 0 : index
    %268 = vector.load %arg2[%267, %c0_85] : memref<64x128xf32, #tpu.memory_space<vmem>>, vector<1x128xf32>
    %c1_i32_86 = arith.constant 1 : i32
    %269 = arith.addi %0, %c1_i32_86 : i32
    %270 = arith.index_cast %c5_i32_83 : i32 to index
    %271 = arith.index_cast %269 : i32 to index
    %272 = memref.load %arg1[%270, %271] : memref<8x8xi32, #tpu.memory_space<smem>>
    %273 = arith.index_cast %272 : i32 to index
    %c0_87 = arith.constant 0 : index
    %274 = vector.load %arg2[%273, %c0_87] : memref<64x128xf32, #tpu.memory_space<vmem>>, vector<1x128xf32>
    %c2_i32_88 = arith.constant 2 : i32
    %275 = arith.addi %0, %c2_i32_88 : i32
    %276 = arith.index_cast %c5_i32_83 : i32 to index
    %277 = arith.index_cast %275 : i32 to index
    %278 = memref.load %arg1[%276, %277] : memref<8x8xi32, #tpu.memory_space<smem>>
    %279 = arith.index_cast %278 : i32 to index
    %c0_89 = arith.constant 0 : index
    %280 = vector.load %arg2[%279, %c0_89] : memref<64x128xf32, #tpu.memory_space<vmem>>, vector<1x128xf32>
    %c3_i32_90 = arith.constant 3 : i32
    %281 = arith.addi %0, %c3_i32_90 : i32
    %282 = arith.index_cast %c5_i32_83 : i32 to index
    %283 = arith.index_cast %281 : i32 to index
    %284 = memref.load %arg1[%282, %283] : memref<8x8xi32, #tpu.memory_space<smem>>
    %285 = arith.index_cast %284 : i32 to index
    %c0_91 = arith.constant 0 : index
    %286 = vector.load %arg2[%285, %c0_91] : memref<64x128xf32, #tpu.memory_space<vmem>>, vector<1x128xf32>
    %c4_i32_92 = arith.constant 4 : i32
    %287 = arith.addi %0, %c4_i32_92 : i32
    %288 = arith.index_cast %c5_i32_83 : i32 to index
    %289 = arith.index_cast %287 : i32 to index
    %290 = memref.load %arg1[%288, %289] : memref<8x8xi32, #tpu.memory_space<smem>>
    %291 = arith.index_cast %290 : i32 to index
    %c0_93 = arith.constant 0 : index
    %292 = vector.load %arg2[%291, %c0_93] : memref<64x128xf32, #tpu.memory_space<vmem>>, vector<1x128xf32>
    %c5_i32_94 = arith.constant 5 : i32
    %293 = arith.addi %0, %c5_i32_94 : i32
    %294 = arith.index_cast %c5_i32_83 : i32 to index
    %295 = arith.index_cast %293 : i32 to index
    %296 = memref.load %arg1[%294, %295] : memref<8x8xi32, #tpu.memory_space<smem>>
    %297 = arith.index_cast %296 : i32 to index
    %c0_95 = arith.constant 0 : index
    %298 = vector.load %arg2[%297, %c0_95] : memref<64x128xf32, #tpu.memory_space<vmem>>, vector<1x128xf32>
    %c6_i32_96 = arith.constant 6 : i32
    %299 = arith.addi %0, %c6_i32_96 : i32
    %300 = arith.index_cast %c5_i32_83 : i32 to index
    %301 = arith.index_cast %299 : i32 to index
    %302 = memref.load %arg1[%300, %301] : memref<8x8xi32, #tpu.memory_space<smem>>
    %303 = arith.index_cast %302 : i32 to index
    %c0_97 = arith.constant 0 : index
    %304 = vector.load %arg2[%303, %c0_97] : memref<64x128xf32, #tpu.memory_space<vmem>>, vector<1x128xf32>
    %c7_i32_98 = arith.constant 7 : i32
    %305 = arith.addi %0, %c7_i32_98 : i32
    %306 = arith.index_cast %c5_i32_83 : i32 to index
    %307 = arith.index_cast %305 : i32 to index
    %308 = memref.load %arg1[%306, %307] : memref<8x8xi32, #tpu.memory_space<smem>>
    %309 = arith.index_cast %308 : i32 to index
    %c0_99 = arith.constant 0 : index
    %310 = vector.load %arg2[%309, %c0_99] : memref<64x128xf32, #tpu.memory_space<vmem>>, vector<1x128xf32>
    %311 = tpu.concatenate %268, %274, %280, %286, %292, %298, %304, %310 in 0 : vector<1x128xf32>, vector<1x128xf32>, vector<1x128xf32>, vector<1x128xf32>, vector<1x128xf32>, vector<1x128xf32>, vector<1x128xf32>, vector<1x128xf32> -> vector<8x128xf32>
    %cst_100 = arith.constant dense<0.000000e+00> : vector<8x128xf32>
    %312 = tpu.matmul %262, %1, %cst_100 {dimension_numbers = #tpu.dot_dimension_numbers<[1], [0], [0], [1], [0, 0, 1, 1], [], []>} : vector<8x128xf32>, vector<128x128xf32>, vector<8x128xf32> -> vector<8x128xf32>
    %313 = arith.addf %311, %312 : vector<8x128xf32>
    %314 = math.tanh %313 : vector<8x128xf32>
    %c6_i32_101 = arith.constant 6 : i32
    %c0_i32_102 = arith.constant 0 : i32
    %315 = arith.addi %0, %c0_i32_102 : i32
    %316 = arith.index_cast %c6_i32_101 : i32 to index
    %317 = arith.index_cast %315 : i32 to index
    %318 = memref.load %arg1[%316, %317] : memref<8x8xi32, #tpu.memory_space<smem>>
    %319 = arith.index_cast %318 : i32 to index
    %c0_103 = arith.constant 0 : index
    %320 = vector.load %arg2[%319, %c0_103] : memref<64x128xf32, #tpu.memory_space<vmem>>, vector<1x128xf32>
    %c1_i32_104 = arith.constant 1 : i32
    %321 = arith.addi %0, %c1_i32_104 : i32
    %322 = arith.index_cast %c6_i32_101 : i32 to index
    %323 = arith.index_cast %321 : i32 to index
    %324 = memref.load %arg1[%322, %323] : memref<8x8xi32, #tpu.memory_space<smem>>
    %325 = arith.index_cast %324 : i32 to index
    %c0_105 = arith.constant 0 : index
    %326 = vector.load %arg2[%325, %c0_105] : memref<64x128xf32, #tpu.memory_space<vmem>>, vector<1x128xf32>
    %c2_i32_106 = arith.constant 2 : i32
    %327 = arith.addi %0, %c2_i32_106 : i32
    %328 = arith.index_cast %c6_i32_101 : i32 to index
    %329 = arith.index_cast %327 : i32 to index
    %330 = memref.load %arg1[%328, %329] : memref<8x8xi32, #tpu.memory_space<smem>>
    %331 = arith.index_cast %330 : i32 to index
    %c0_107 = arith.constant 0 : index
    %332 = vector.load %arg2[%331, %c0_107] : memref<64x128xf32, #tpu.memory_space<vmem>>, vector<1x128xf32>
    %c3_i32_108 = arith.constant 3 : i32
    %333 = arith.addi %0, %c3_i32_108 : i32
    %334 = arith.index_cast %c6_i32_101 : i32 to index
    %335 = arith.index_cast %333 : i32 to index
    %336 = memref.load %arg1[%334, %335] : memref<8x8xi32, #tpu.memory_space<smem>>
    %337 = arith.index_cast %336 : i32 to index
    %c0_109 = arith.constant 0 : index
    %338 = vector.load %arg2[%337, %c0_109] : memref<64x128xf32, #tpu.memory_space<vmem>>, vector<1x128xf32>
    %c4_i32_110 = arith.constant 4 : i32
    %339 = arith.addi %0, %c4_i32_110 : i32
    %340 = arith.index_cast %c6_i32_101 : i32 to index
    %341 = arith.index_cast %339 : i32 to index
    %342 = memref.load %arg1[%340, %341] : memref<8x8xi32, #tpu.memory_space<smem>>
    %343 = arith.index_cast %342 : i32 to index
    %c0_111 = arith.constant 0 : index
    %344 = vector.load %arg2[%343, %c0_111] : memref<64x128xf32, #tpu.memory_space<vmem>>, vector<1x128xf32>
    %c5_i32_112 = arith.constant 5 : i32
    %345 = arith.addi %0, %c5_i32_112 : i32
    %346 = arith.index_cast %c6_i32_101 : i32 to index
    %347 = arith.index_cast %345 : i32 to index
    %348 = memref.load %arg1[%346, %347] : memref<8x8xi32, #tpu.memory_space<smem>>
    %349 = arith.index_cast %348 : i32 to index
    %c0_113 = arith.constant 0 : index
    %350 = vector.load %arg2[%349, %c0_113] : memref<64x128xf32, #tpu.memory_space<vmem>>, vector<1x128xf32>
    %c6_i32_114 = arith.constant 6 : i32
    %351 = arith.addi %0, %c6_i32_114 : i32
    %352 = arith.index_cast %c6_i32_101 : i32 to index
    %353 = arith.index_cast %351 : i32 to index
    %354 = memref.load %arg1[%352, %353] : memref<8x8xi32, #tpu.memory_space<smem>>
    %355 = arith.index_cast %354 : i32 to index
    %c0_115 = arith.constant 0 : index
    %356 = vector.load %arg2[%355, %c0_115] : memref<64x128xf32, #tpu.memory_space<vmem>>, vector<1x128xf32>
    %c7_i32_116 = arith.constant 7 : i32
    %357 = arith.addi %0, %c7_i32_116 : i32
    %358 = arith.index_cast %c6_i32_101 : i32 to index
    %359 = arith.index_cast %357 : i32 to index
    %360 = memref.load %arg1[%358, %359] : memref<8x8xi32, #tpu.memory_space<smem>>
    %361 = arith.index_cast %360 : i32 to index
    %c0_117 = arith.constant 0 : index
    %362 = vector.load %arg2[%361, %c0_117] : memref<64x128xf32, #tpu.memory_space<vmem>>, vector<1x128xf32>
    %363 = tpu.concatenate %320, %326, %332, %338, %344, %350, %356, %362 in 0 : vector<1x128xf32>, vector<1x128xf32>, vector<1x128xf32>, vector<1x128xf32>, vector<1x128xf32>, vector<1x128xf32>, vector<1x128xf32>, vector<1x128xf32> -> vector<8x128xf32>
    %cst_118 = arith.constant dense<0.000000e+00> : vector<8x128xf32>
    %364 = tpu.matmul %314, %1, %cst_118 {dimension_numbers = #tpu.dot_dimension_numbers<[1], [0], [0], [1], [0, 0, 1, 1], [], []>} : vector<8x128xf32>, vector<128x128xf32>, vector<8x128xf32> -> vector<8x128xf32>
    %365 = arith.addf %363, %364 : vector<8x128xf32>
    %366 = math.tanh %365 : vector<8x128xf32>
    %c7_i32_119 = arith.constant 7 : i32
    %c0_i32_120 = arith.constant 0 : i32
    %367 = arith.addi %0, %c0_i32_120 : i32
    %368 = arith.index_cast %c7_i32_119 : i32 to index
    %369 = arith.index_cast %367 : i32 to index
    %370 = memref.load %arg1[%368, %369] : memref<8x8xi32, #tpu.memory_space<smem>>
    %371 = arith.index_cast %370 : i32 to index
    %c0_121 = arith.constant 0 : index
    %372 = vector.load %arg2[%371, %c0_121] : memref<64x128xf32, #tpu.memory_space<vmem>>, vector<1x128xf32>
    %c1_i32_122 = arith.constant 1 : i32
    %373 = arith.addi %0, %c1_i32_122 : i32
    %374 = arith.index_cast %c7_i32_119 : i32 to index
    %375 = arith.index_cast %373 : i32 to index
    %376 = memref.load %arg1[%374, %375] : memref<8x8xi32, #tpu.memory_space<smem>>
    %377 = arith.index_cast %376 : i32 to index
    %c0_123 = arith.constant 0 : index
    %378 = vector.load %arg2[%377, %c0_123] : memref<64x128xf32, #tpu.memory_space<vmem>>, vector<1x128xf32>
    %c2_i32_124 = arith.constant 2 : i32
    %379 = arith.addi %0, %c2_i32_124 : i32
    %380 = arith.index_cast %c7_i32_119 : i32 to index
    %381 = arith.index_cast %379 : i32 to index
    %382 = memref.load %arg1[%380, %381] : memref<8x8xi32, #tpu.memory_space<smem>>
    %383 = arith.index_cast %382 : i32 to index
    %c0_125 = arith.constant 0 : index
    %384 = vector.load %arg2[%383, %c0_125] : memref<64x128xf32, #tpu.memory_space<vmem>>, vector<1x128xf32>
    %c3_i32_126 = arith.constant 3 : i32
    %385 = arith.addi %0, %c3_i32_126 : i32
    %386 = arith.index_cast %c7_i32_119 : i32 to index
    %387 = arith.index_cast %385 : i32 to index
    %388 = memref.load %arg1[%386, %387] : memref<8x8xi32, #tpu.memory_space<smem>>
    %389 = arith.index_cast %388 : i32 to index
    %c0_127 = arith.constant 0 : index
    %390 = vector.load %arg2[%389, %c0_127] : memref<64x128xf32, #tpu.memory_space<vmem>>, vector<1x128xf32>
    %c4_i32_128 = arith.constant 4 : i32
    %391 = arith.addi %0, %c4_i32_128 : i32
    %392 = arith.index_cast %c7_i32_119 : i32 to index
    %393 = arith.index_cast %391 : i32 to index
    %394 = memref.load %arg1[%392, %393] : memref<8x8xi32, #tpu.memory_space<smem>>
    %395 = arith.index_cast %394 : i32 to index
    %c0_129 = arith.constant 0 : index
    %396 = vector.load %arg2[%395, %c0_129] : memref<64x128xf32, #tpu.memory_space<vmem>>, vector<1x128xf32>
    %c5_i32_130 = arith.constant 5 : i32
    %397 = arith.addi %0, %c5_i32_130 : i32
    %398 = arith.index_cast %c7_i32_119 : i32 to index
    %399 = arith.index_cast %397 : i32 to index
    %400 = memref.load %arg1[%398, %399] : memref<8x8xi32, #tpu.memory_space<smem>>
    %401 = arith.index_cast %400 : i32 to index
    %c0_131 = arith.constant 0 : index
    %402 = vector.load %arg2[%401, %c0_131] : memref<64x128xf32, #tpu.memory_space<vmem>>, vector<1x128xf32>
    %c6_i32_132 = arith.constant 6 : i32
    %403 = arith.addi %0, %c6_i32_132 : i32
    %404 = arith.index_cast %c7_i32_119 : i32 to index
    %405 = arith.index_cast %403 : i32 to index
    %406 = memref.load %arg1[%404, %405] : memref<8x8xi32, #tpu.memory_space<smem>>
    %407 = arith.index_cast %406 : i32 to index
    %c0_133 = arith.constant 0 : index
    %408 = vector.load %arg2[%407, %c0_133] : memref<64x128xf32, #tpu.memory_space<vmem>>, vector<1x128xf32>
    %c7_i32_134 = arith.constant 7 : i32
    %409 = arith.addi %0, %c7_i32_134 : i32
    %410 = arith.index_cast %c7_i32_119 : i32 to index
    %411 = arith.index_cast %409 : i32 to index
    %412 = memref.load %arg1[%410, %411] : memref<8x8xi32, #tpu.memory_space<smem>>
    %413 = arith.index_cast %412 : i32 to index
    %c0_135 = arith.constant 0 : index
    %414 = vector.load %arg2[%413, %c0_135] : memref<64x128xf32, #tpu.memory_space<vmem>>, vector<1x128xf32>
    %415 = tpu.concatenate %372, %378, %384, %390, %396, %402, %408, %414 in 0 : vector<1x128xf32>, vector<1x128xf32>, vector<1x128xf32>, vector<1x128xf32>, vector<1x128xf32>, vector<1x128xf32>, vector<1x128xf32>, vector<1x128xf32> -> vector<8x128xf32>
    %cst_136 = arith.constant dense<0.000000e+00> : vector<8x128xf32>
    %416 = tpu.matmul %366, %1, %cst_136 {dimension_numbers = #tpu.dot_dimension_numbers<[1], [0], [0], [1], [0, 0, 1, 1], [], []>} : vector<8x128xf32>, vector<128x128xf32>, vector<8x128xf32> -> vector<8x128xf32>
    %417 = arith.addf %415, %416 : vector<8x128xf32>
    %418 = math.tanh %417 : vector<8x128xf32>
    %c8_i32_137 = arith.constant 8 : i32
    %c0_138 = arith.constant 0 : index
    %c0_139 = arith.constant 0 : index
    %419 = vector.load %arg4[%c0_138, %c0_139] : memref<128x128xf32, #tpu.memory_space<vmem>>, vector<128x128xf32>
    %cst_140 = arith.constant dense<0.000000e+00> : vector<8x128xf32>
    %420 = tpu.matmul %418, %419, %cst_140 {dimension_numbers = #tpu.dot_dimension_numbers<[1], [0], [0], [1], [0, 0, 1, 1], [], []>} : vector<8x128xf32>, vector<128x128xf32>, vector<8x128xf32> -> vector<8x128xf32>
    %c0_141 = arith.constant 0 : index
    %c0_142 = arith.constant 0 : index
    %421 = vector.load %arg5[%c0_141, %c0_142] : memref<1x128xf32, #tpu.memory_space<vmem>>, vector<1x128xf32>
    %422 = vector.broadcast %421 : vector<1x128xf32> to vector<8x128xf32>
    %423 = arith.addf %420, %422 : vector<8x128xf32>
    %cst_143 = arith.constant dense<0xFF800000> : vector<8xf32>
    %424 = vector.multi_reduction <maximumf>, %423, %cst_143 [1] : vector<8x128xf32> to vector<8xf32>
    %425 = vector.shape_cast %424 : vector<8xf32> to vector<8x1xf32>
    %426 = vector.broadcast %425 : vector<8x1xf32> to vector<8x128xf32>
    %427 = arith.subf %423, %426 : vector<8x128xf32>
    %428 = math.exp %427 : vector<8x128xf32>
    %cst_144 = arith.constant dense<0.000000e+00> : vector<8xf32>
    %429 = vector.multi_reduction <add>, %428, %cst_144 [1] : vector<8x128xf32> to vector<8xf32>
    %430 = vector.shape_cast %429 : vector<8xf32> to vector<8x1xf32>
    %431 = tpu.reciprocal %430 {approx = true} : vector<8x1xf32> -> vector<8x1xf32>
    %432 = arith.mulf %430, %431 : vector<8x1xf32>
    %cst_145 = arith.constant 2.000000e+00 : f32
    %433 = vector.broadcast %cst_145 : f32 to vector<8x1xf32>
    %434 = arith.subf %433, %432 : vector<8x1xf32>
    %435 = arith.mulf %431, %434 : vector<8x1xf32>
    %436 = vector.broadcast %435 : vector<8x1xf32> to vector<8x128xf32>
    %437 = arith.mulf %428, %436 : vector<8x128xf32>
    %c0_146 = arith.constant 0 : index
    %c0_147 = arith.constant 0 : index
    %438 = vector.load %arg6[%c0_146, %c0_147] : memref<8x128xf32, #tpu.memory_space<vmem>>, vector<8x128xf32>
    tpu.vector_store %arg6[%c0_146, %c0_147], %437 {strides = array<i32>} : memref<8x128xf32, #tpu.memory_space<vmem>>, vector<8x128xf32>,
    return
  }
  func.func @transform_0(%arg0: i32, %arg1: memref<8x8xi32, #tpu.memory_space<smem>>) -> (i32, i32) {
    %c0_i32 = arith.constant 0 : i32
    %c0_i32_0 = arith.constant 0 : i32
    %c0_i32_1 = arith.constant 0 : i32
    return %c0_i32, %c0_i32_0 : i32, i32
  }
  func.func @transform_1(%arg0: i32, %arg1: memref<8x8xi32, #tpu.memory_space<smem>>) -> (i32, i32) {
    %c0_i32 = arith.constant 0 : i32
    %c0_i32_0 = arith.constant 0 : i32
    %c0_i32_1 = arith.constant 0 : i32
    return %c0_i32, %c0_i32_0 : i32, i32
  }
  func.func @transform_2(%arg0: i32, %arg1: memref<8x8xi32, #tpu.memory_space<smem>>) -> (i32, i32) {
    %c0_i32 = arith.constant 0 : i32
    %c0_i32_0 = arith.constant 0 : i32
    %c0_i32_1 = arith.constant 0 : i32
    return %c0_i32, %c0_i32_0 : i32, i32
  }
  func.func @transform_3(%arg0: i32, %arg1: memref<8x8xi32, #tpu.memory_space<smem>>) -> (i32, i32) {
    %c0_i32 = arith.constant 0 : i32
    %c0_i32_0 = arith.constant 0 : i32
    %c0_i32_1 = arith.constant 0 : i32
    return %c0_i32, %c0_i32_0 : i32, i32
  }
  func.func @transform_4(%arg0: i32, %arg1: memref<8x8xi32, #tpu.memory_space<smem>>) -> (i32, i32) {
    %c0_i32 = arith.constant 0 : i32
    %c0_i32_0 = arith.constant 0 : i32
    return %arg0, %c0_i32 : i32, i32
  }
}

</mosaic_0001>

<bundles_post_ra>
// kernel: rnn_forward.1
= control target key start
LH: loop header
LB: loop body
LE: loop exit
PB: predicated region body
PF: predicated region fallthrough
CT: control target
= control target key end

     0   :  { %s2765_s0 = inlined_call_operand.vmem [shape: s32[8,8], index: 0, kind: input, shape index: {}]   ;;  %s2766_s1 = inlined_call_operand.vmem [shape: f32[64,128], index: 1, kind: input, shape index: {}]   ;;  %s2767_s2 = inlined_call_operand.vmem [shape: f32[128,128], index: 2, kind: input, shape index: {}]   ;;  %s2768_s3 = inlined_call_operand.vmem [shape: f32[128,128], index: 3, kind: input, shape index: {}]   ;;  %s2769_s4 = inlined_call_operand.vmem [shape: f32[1,128], index: 4, kind: input, shape index: {}]   ;;  %s2770_s5 = inlined_call_operand.vmem [shape: f32[8,128], index: 5, kind: output, shape index: {}]  }
   0x1   :  { %s10_s20 = sshll.u32 %s2765_s0, 4  ;;  %s11_s20 = int_to_ptr.vmem [resolvable:$true] %s10_s20 }
   0x2   :  { %s2193_s21 = scalar_lea.vmem %s11_s20, 128  ;;  %p2198_p1 = scmp.lt.s32.totalorder %s11_s20, %s11_s20 }
   0x3   :  { %p2194_p0 = scmp.ne.s32.totalorder %s11_s20, %s2193_s21  ;;  %p2199_p2 = scmp.lt.s32.totalorder %s2193_s21, %s2193_s21 }
   0x5   :  { %p2200_p3 = por %p2199_p2, %p2198_p1 }
   0x7   :  { %p2201_p4 = pnand %p2200_p3, %p2194_p0 }
   0x9   :  { %2204 = shalt.err (!%p2201_p4)  }
   0xa   :  { %s2207_s22 = smov [#allocation3]  }
   0xb   :  { %13 = dma.vmem_to_smem %s11_s20, 128, %s2207_s22, [#allocation2] }
   0xc   :  { %2205 = dma.done.wait [#allocation2], 128 }
   0xd   :  { %2206 = vsyncadd [#allocation2], 4294967168 }
   0xe   :  { %15 = sfence }
   0xf   :  { %v25_v0 = vld [vmem:[%s2767_s2] sm:$0xff]  ;;  %v26_v1 = vld [vmem:[%s2767_s2 + $0x8] sm:$0xff]  ;;  %v27_v2 = vld [vmem:[%s2767_s2 + $0x10] sm:$0xff]  ;;  %v2208_v3 = vmov 0.0|0.0   ;;  %vm2209_vm0 = vmmov 0   ;;  %v2210_v6 = vmov 0.0  }
  0x10   :  { %1953 = vmatprep.subr.bf16.mxu0 %v2208_v3  ;;  %v2254_v4 = vpack.c.bf16 %v26_v1, %v25_v0  ;;  %v28_v5 = vld [vmem:[%s2767_s2 + $0x18] sm:$0xff]  ;;  %1670 = vmatprep.mubr.msk.f32.mxu0 %vm2209_vm0, %v2210_v6  ;;  %v29_v8 = vld [vmem:[%s2767_s2 + $0x20] sm:$0xff]  ;;  %v30_v9 = vld [vmem:[%s2767_s2 + $0x28] sm:$0xff]  ;;  %s1422_s28 = sld [smem:[#allocation3 + $0x2]]  ;;  %s41_s29 = sld [smem:[#allocation3]]  ;;  %vm93_vm1 = vcmask 1040384  }
  0x11   :  { %1977 = vmatprep.subr.bf16.mxu1 %v2208_v3  ;;  %1705 = vmatprep.mubr.msk.f32.mxu1 %vm2209_vm0, %v2210_v6  ;;  %v2265_v7 = vpack.c.bf16 %v28_v5, %v27_v2  ;;  %v2277_v10 = vpack.c.bf16 %v30_v9, %v29_v8  ;;  %v31_v11 = vld [vmem:[%s2767_s2 + $0x30] sm:$0xff]  ;;  %v32_v12 = vld [vmem:[%s2767_s2 + $0x38] sm:$0xff]  ;;  %v33_v14 = vld [vmem:[%s2767_s2 + $0x40] sm:$0xff]  ;;  %s1423_s30 = sld [smem:[#allocation3 + $0x3]]  ;;  %s1424_s9 = sld [smem:[#allocation3 + $0x4]]  ;;  %vm95_vm2 = vcmask 1041408  }
  0x12   :  { %1955 = vmatpush3.bf16.msra.mxu0 %v2254_v4  ;;  %1979 = vmatpush3.bf16.msra.mxu1 %v2254_v4  ;;  %v2289_v13 = vpack.c.bf16 %v32_v12, %v31_v11  ;;  %v34_v15 = vld [vmem:[%s2767_s2 + $0x48] sm:$0xff]  ;;  %v35_v17 = vld [vmem:[%s2767_s2 + $0x50] sm:$0xff]  ;;  %v36_v18 = vld [vmem:[%s2767_s2 + $0x58] sm:$0xff]  ;;  %s1425_s16 = sld [smem:[#allocation3 + $0x5]]  ;;  %s1426_s20 = sld [smem:[#allocation3 + $0x6]]  ;;  %vm97_vm3 = vcmask 1042432  }
  0x13   :  { %1956 = vmatprep.subr.bf16.mxu0 %v2208_v3  ;;  %1980 = vmatprep.subr.bf16.mxu1 %v2208_v3  ;;  %v2301_v16 = vpack.c.bf16 %v34_v15, %v33_v14  ;;  %v2313_v19 = vpack.c.bf16 %v36_v18, %v35_v17  ;;  %v37_v20 = vld [vmem:[%s2767_s2 + $0x60] sm:$0xff]  ;;  %v38_v21 = vld [vmem:[%s2767_s2 + $0x68] sm:$0xff]  ;;  %v39_v23 = vld [vmem:[%s2767_s2 + $0x70] sm:$0xff]  ;;  %s1427_s24 = sld [smem:[#allocation3 + $0x7]]  ;;  %vm99_vm4 = vcmask 1043456   ;;  %vm101_vm5 = vcmask 1044480  }
  0x14   :  { %v2325_v22 = vpack.c.bf16 %v38_v21, %v37_v20  ;;  %v40_v24 = vld [vmem:[%s2767_s2 + $0x78] sm:$0xff]  ;;  %s1421_s2 = sld [smem:[#allocation3 + $0x1]]  ;;  %vm103_vm6 = vcmask 1045504   ;;  %vm105_vm7 = vcmask 1046528   ;;  %s1431_s10 = sld [smem:[#allocation3 + $0x83]] }
  0x15   :  { %v2337_v25 = vpack.c.bf16 %v40_v24, %v39_v23  ;;  %s1429_s7 = sld [smem:[#allocation3 + $0x81]]  ;;  %s1432_s14 = sld [smem:[#allocation3 + $0x84]] }
  0x16   :  { %1958 = vmatpush3.bf16.msra.mxu0 %v2265_v7  ;;  %1982 = vmatpush3.bf16.msra.mxu1 %v2265_v7  ;;  %s50_s12 = scalar_lea.vmem %s2766_s1, %s1422_s28  ;;  %s42_s15 = scalar_lea.vmem %s2766_s1, %s41_s29 }
  0x17   :  { %1959 = vmatprep.subr.bf16.mxu0 %v2208_v3  ;;  %1983 = vmatprep.subr.bf16.mxu1 %v2208_v3  ;;  %v51_v27 = vld [vmem:[%s50_s12] sm:$0x1]  ;;  %s54_s19 = scalar_lea.vmem %s2766_s1, %s1423_s30  ;;  %s58_s23 = scalar_lea.vmem %s2766_s1, %s1424_s9 }
  0x18   :  { %v43_v29 = vld [vmem:[%s42_s15] sm:$0x1]  ;;  %v76_v31 = vrot.slane %v51_v27, 6  ;;  %s62_s0 = scalar_lea.vmem %s2766_s1, %s1425_s16  ;;  %s66_s28 = scalar_lea.vmem %s2766_s1, %s1426_s20 }
  0x19   :  { %v55_v30 = vld [vmem:[%s54_s19] sm:$0x1]  ;;  %s70_s6 = scalar_lea.vmem %s2766_s1, %s1427_s24  ;;  %s1428_s9 = sld [smem:[#allocation3 + $0x80]] }
  0x1a   :  { %1961 = vmatpush3.bf16.msra.mxu0 %v2277_v10  ;;  %1985 = vmatpush3.bf16.msra.mxu1 %v2277_v10  ;;  %s46_s8 = scalar_lea.vmem %s2766_s1, %s1421_s2  ;;  %v59_v33 = vld [vmem:[%s58_s23] sm:$0x1]  ;;  %v79_v34 = vrot.slane %v55_v30, 5  ;;  %s1433_s21 = sld [smem:[#allocation3 + $0x85]] }
  0x1b   :  { %1962 = vmatprep.subr.bf16.mxu0 %v2208_v3  ;;  %1986 = vmatprep.subr.bf16.mxu1 %v2208_v3  ;;  %v47_v26 = vld [vmem:[%s46_s8] sm:$0x1]  ;;  %v82_v37 = vrot.slane %v59_v33, 4  ;;  %s1430_s8 = sld [smem:[#allocation3 + $0x82]]  ;;  %s197_s13 = scalar_lea.vmem %s2766_s1, %s1429_s7 }
  0x1c   :  { %v73_v28 = vrot.slane %v47_v26, 7  ;;  %v63_v36 = vld [vmem:[%s62_s0] sm:$0x1]  ;;  %s217_s24 = scalar_lea.vmem %s2766_s1, %s1431_s10  ;;  %s1434_s25 = sld [smem:[#allocation3 + $0x86]] }
  0x1d   :  { %v67_v39 = vld [vmem:[%s66_s28] sm:$0x1]  ;;  %v85_v40 = vrot.slane %v63_v36, 3  ;;  %s227_s27 = scalar_lea.vmem %s2766_s1, %s1432_s14  ;;  %s1435_s2 = sld [smem:[#allocation3 + $0x87]] }
  0x1e   :  { %1964 = vmatpush3.bf16.msra.mxu0 %v2289_v13  ;;  %1988 = vmatpush3.bf16.msra.mxu1 %v2289_v13  ;;  %v94_v32 = vsel %vm93_vm1, %v43_v29, %v73_v28  ;;  %v71_v42 = vld [vmem:[%s70_s6] sm:$0x1]  ;;  %v88_v43 = vrot.slane %v67_v39, 2  ;;  %s1437_s12 = sld [smem:[#allocation3 + $0x101]]  ;;  %s1436_s14 = sld [smem:[#allocation3 + $0x100]] }
  0x1f   :  { %1965 = vmatprep.subr.bf16.mxu0 %v2208_v3  ;;  %1989 = vmatprep.subr.bf16.mxu1 %v2208_v3  ;;  %v96_v35 = vsel %vm95_vm2, %v94_v32, %v76_v31  ;;  %v91_v45 = vrot.slane %v71_v42, 1  ;;  %v198_v52 = vld [vmem:[%s197_s13] sm:$0x1]  ;;  %s187_s20 = scalar_lea.vmem %s2766_s1, %s1428_s9  ;;  %s1438_s13 = sld [smem:[#allocation3 + $0x102]] }
  0x20   :  { %v98_v38 = vsel %vm97_vm3, %v96_v35, %v79_v34  ;;  %v260_v54 = vrot.slane %v198_v52, 7  ;;  %v188_v55 = vld [vmem:[%s187_s20] sm:$0x1]  ;;  %s237_s30 = scalar_lea.vmem %s2766_s1, %s1433_s21  ;;  %s1439_s15 = sld [smem:[#allocation3 + $0x103]] }
  0x21   :  { %v100_v41 = vsel %vm99_vm4, %v98_v38, %v82_v37  ;;  %s207_s17 = scalar_lea.vmem %s2766_s1, %s1430_s8  ;;  %v218_v56 = vld [vmem:[%s217_s24] sm:$0x1]  ;;  %s1440_s19 = sld [smem:[#allocation3 + $0x104]] }
  0x22   :  { %1967 = vmatpush3.bf16.msra.mxu0 %v2301_v16  ;;  %1991 = vmatpush3.bf16.msra.mxu1 %v2301_v16  ;;  %v102_v44 = vsel %vm101_vm5, %v100_v41, %v85_v40  ;;  %v208_v53 = vld [vmem:[%s207_s17] sm:$0x1]  ;;  %v280_v58 = vsel %vm93_vm1, %v188_v55, %v260_v54  ;;  %v266_v60 = vrot.slane %v218_v56, 5  ;;  %s247_s8 = scalar_lea.vmem %s2766_s1, %s1434_s25  ;;  %s1441_s26 = sld [smem:[#allocation3 + $0x105]] }
  0x23   :  { %1968 = vmatprep.subr.bf16.mxu0 %v2208_v3  ;;  %1992 = vmatprep.subr.bf16.mxu1 %v2208_v3  ;;  %v104_v46 = vsel %vm103_vm6, %v102_v44, %v88_v43  ;;  %v263_v57 = vrot.slane %v208_v53, 6  ;;  %v228_v59 = vld [vmem:[%s227_s27] sm:$0x1]  ;;  %s257_s11 = scalar_lea.vmem %s2766_s1, %s1435_s2  ;;  %s1442_s28 = sld [smem:[#allocation3 + $0x106]] }
  0x24   :  { %v106_v47 = vsel %vm105_vm7, %v104_v46, %v91_v45  ;;  %v238_v62 = vld [vmem:[%s237_s30] sm:$0x1]  ;;  %v269_v63 = vrot.slane %v228_v59, 4  ;;  %s369_s18 = scalar_lea.vmem %s2766_s1, %s1437_s12  ;;  %s363_s25 = scalar_lea.vmem %s2766_s1, %s1436_s14 }
  0x25   :  { %v281_v61 = vsel %vm95_vm2, %v280_v58, %v263_v57  ;;  %v248_v1 = vld [vmem:[%s247_s8] sm:$0x1]  ;;  %v272_v2 = vrot.slane %v238_v62, 3  ;;  %s375_s22 = scalar_lea.vmem %s2766_s1, %s1438_s13  ;;  %s1443_s7 = sld [smem:[#allocation3 + $0x107]] }
  0x26   :  { %1970 = vmatpush3.bf16.msra.mxu0 %v2313_v19  ;;  %1994 = vmatpush3.bf16.msra.mxu1 %v2313_v19  ;;  %v282_v0 = vsel %vm97_vm3, %v281_v61, %v266_v60  ;;  %v258_v8 = vld [vmem:[%s257_s11] sm:$0x1]  ;;  %v275_v9 = vrot.slane %v248_v1, 2  ;;  %s381_s2 = scalar_lea.vmem %s2766_s1, %s1439_s15  ;;  %s1445_s17 = sld [smem:[#allocation3 + $0x181]] }
  0x27   :  { %1971 = vmatprep.subr.bf16.mxu0 %v2208_v3  ;;  %1995 = vmatprep.subr.bf16.mxu1 %v2208_v3  ;;  %v283_v5 = vsel %vm99_vm4, %v282_v0, %v269_v63  ;;  %v278_v12 = vrot.slane %v258_v8, 1  ;;  %v370_v23 = vld [vmem:[%s369_s18] sm:$0x1]  ;;  %s387_s6 = scalar_lea.vmem %s2766_s1, %s1440_s19  ;;  %s1446_s18 = sld [smem:[#allocation3 + $0x182]] }
  0x28   :  { %v284_v11 = vsel %vm101_vm5, %v283_v5, %v272_v2  ;;  %v376_v24 = vld [vmem:[%s375_s22] sm:$0x1]  ;;  %v408_v26 = vrot.slane %v370_v23, 7  ;;  %s393_s10 = scalar_lea.vmem %s2766_s1, %s1441_s26  ;;  %s1444_s19 = sld [smem:[#allocation3 + $0x180]] }
  0x29   :  { %v285_v14 = vsel %vm103_vm6, %v284_v11, %v275_v9  ;;  %v364_v27 = vld [vmem:[%s363_s25] sm:$0x1]  ;;  %v411_v29 = vrot.slane %v376_v24, 6  ;;  %s399_s13 = scalar_lea.vmem %s2766_s1, %s1442_s28  ;;  %s1447_s20 = sld [smem:[#allocation3 + $0x183]] }
  0x2a   :  { %1973 = vmatpush3.bf16.msra.mxu0 %v2325_v22  ;;  %1997 = vmatpush3.bf16.msra.mxu1 %v2325_v22  ;;  %v286_v15 = vsel %vm105_vm7, %v285_v14, %v278_v12  ;;  %v382_v28 = vld [vmem:[%s381_s2] sm:$0x1]  ;;  %v428_v30 = vsel %vm93_vm1, %v364_v27, %v408_v26  ;;  %s1448_s24 = sld [smem:[#allocation3 + $0x184]]  ;;  %s1449_s29 = sld [smem:[#allocation3 + $0x185]] }
  0x2b   :  { %1974 = vmatprep.subr.bf16.mxu0 %v2208_v3  ;;  %1998 = vmatprep.subr.bf16.mxu1 %v2208_v3  ;;  %v388_v31 = vld [vmem:[%s387_s6] sm:$0x1]  ;;  %v414_v32 = vrot.slane %v382_v28, 5  ;;  %v429_v33 = vsel %vm95_vm2, %v428_v30, %v411_v29  ;;  %s405_s16 = scalar_lea.vmem %s2766_s1, %s1443_s7  ;;  %s1450_s8 = sld [smem:[#allocation3 + $0x186]] }
  0x2c   :  { %v394_v34 = vld [vmem:[%s393_s10] sm:$0x1]  ;;  %v417_v35 = vrot.slane %v388_v31, 4  ;;  %s517_s23 = scalar_lea.vmem %s2766_s1, %s1445_s17  ;;  %s1451_s12 = sld [smem:[#allocation3 + $0x187]] }
  0x2d   :  { %v430_v36 = vsel %vm97_vm3, %v429_v33, %v414_v32  ;;  %v400_v37 = vld [vmem:[%s399_s13] sm:$0x1]  ;;  %v420_v38 = vrot.slane %v394_v34, 3  ;;  %s523_s0 = scalar_lea.vmem %s2766_s1, %s1446_s18  ;;  %s1453_s22 = sld [smem:[#allocation3 + $0x201]] }
  0x2e   :  { %1976 = vmatpush3.bf16.msra.mxu0 %v2337_v25  ;;  %2000 = vmatpush3.bf16.msra.mxu1 %v2337_v25  ;;  %v431_v39 = vsel %vm99_vm4, %v430_v36, %v417_v35  ;;  %v406_v40 = vld [vmem:[%s405_s16] sm:$0x1]  ;;  %v423_v41 = vrot.slane %v400_v37, 2  ;;  %s511_s28 = scalar_lea.vmem %s2766_s1, %s1444_s19  ;;  %s1455_s25 = sld [smem:[#allocation3 + $0x203]] }
  0x2f   :  { %2001 = vmatprep.subr.bf16.mxu0 %v2208_v3  ;;  %2025 = vmatprep.subr.bf16.mxu1 %v2208_v3  ;;  %v432_v42 = vsel %vm101_vm5, %v431_v39, %v420_v38  ;;  %v426_v43 = vrot.slane %v406_v40, 1  ;;  %s529_s7 = scalar_lea.vmem %s2766_s1, %s1447_s20  ;;  %v512_v53 = vld [vmem:[%s511_s28] sm:$0x1]  ;;  %s1456_s2 = sld [smem:[#allocation3 + $0x204]] }
  0x30   :  { %v433_v44 = vsel %vm103_vm6, %v432_v42, %v423_v41  ;;  %v530_v54 = vld [vmem:[%s529_s7] sm:$0x1]  ;;  %s535_s11 = scalar_lea.vmem %s2766_s1, %s1448_s24  ;;  %s541_s15 = scalar_lea.vmem %s2766_s1, %s1449_s29 }
  0x31   :  { %1671 = vmatmul.mubr.f32.vlgmr.msra.gmra.mrb[0].mxu0 %v2210_v6  ;;  %v434_v45 = vsel %vm105_vm7, %v433_v44, %v426_v43  ;;  %v536_v57 = vld [vmem:[%s535_s11] sm:$0x1]  ;;  %v562_v58 = vrot.slane %v530_v54, 5  ;;  %s547_s18 = scalar_lea.vmem %s2766_s1, %s1450_s8  ;;  %s1452_s24 = sld [smem:[#allocation3 + $0x200]] }
  0x32   :  { %2003 = vmatpush3.bf16.msra.mxu0 %v2254_v4  ;;  %1740 = vmatprep.mubr.msk.f32.mxu0 %vm2209_vm0, %v2210_v6  ;;  %v542_v60 = vld [vmem:[%s541_s15] sm:$0x1]  ;;  %v565_v61 = vrot.slane %v536_v57, 4  ;;  %s553_s21 = scalar_lea.vmem %s2766_s1, %s1451_s12  ;;  %s1457_s9 = sld [smem:[#allocation3 + $0x205]] }
  0x33   :  { %2004 = vmatprep.subr.bf16.mxu0 %v2208_v3  ;;  %v548_v63 = vld [vmem:[%s547_s18] sm:$0x1]  ;;  %v568_v0 = vrot.slane %v542_v60, 3  ;;  %s665_s27 = scalar_lea.vmem %s2766_s1, %s1453_s22  ;;  %s1458_s13 = sld [smem:[#allocation3 + $0x206]] }
  0x34   :  { %v554_v2 = vld [vmem:[%s553_s21] sm:$0x1]  ;;  %v571_v5 = vrot.slane %v548_v63, 2  ;;  %s677_s12 = scalar_lea.vmem %s2766_s1, %s1455_s25  ;;  %s1459_s17 = sld [smem:[#allocation3 + $0x207]] }
  0x35   :  { %v574_v9 = vrot.slane %v554_v2, 1  ;;  %v678_v26 = vld [vmem:[%s677_s12] sm:$0x1]  ;;  %s683_s16 = scalar_lea.vmem %s2766_s1, %s1456_s2  ;;  %s1460_s2 = sld [smem:[#allocation3 + $0x280]] }
  0x36   :  { %2006 = vmatpush3.bf16.msra.mxu0 %v2265_v7  ;;  %v684_v29 = vld [vmem:[%s683_s16] sm:$0x1]  ;;  %v710_v30 = vrot.slane %v678_v26, 5  ;;  %s1463_s28 = sld [smem:[#allocation3 + $0x283]]  ;;  %s1464_s7 = sld [smem:[#allocation3 + $0x284]] }
  0x37   :  { %2007 = vmatprep.subr.bf16.mxu0 %v2208_v3  ;;  %s659_s8 = scalar_lea.vmem %s2766_s1, %s1452_s24  ;;  %v713_v33 = vrot.slane %v684_v29, 4  ;;  %s1465_s14 = sld [smem:[#allocation3 + $0x285]]  ;;  %v1247_v2 = vld [vmem:[%s2768_s3] sm:$0xff] }
  0x38   :  { %v660_v24 = vld [vmem:[%s659_s8] sm:$0x1]  ;;  %s689_s20 = scalar_lea.vmem %s2766_s1, %s1457_s9  ;;  %s1466_s18 = sld [smem:[#allocation3 + $0x286]] }
  0x39   :  { %v690_v32 = vld [vmem:[%s689_s20] sm:$0x1]  ;;  %s1467_s22 = sld [smem:[#allocation3 + $0x287]]  ;;  %s1473_s12 = sld [smem:[#allocation3 + $0x305]] }
  0x3a   :  { %2009 = vmatpush3.bf16.msra.mxu0 %v2277_v10  ;;  %s701_s26 = scalar_lea.vmem %s2766_s1, %s1459_s17  ;;  %v716_v36 = vrot.slane %v690_v32, 3  ;;  %s1474_s16 = sld [smem:[#allocation3 + $0x306]] }
  0x3b   :  { %2010 = vmatprep.subr.bf16.mxu0 %v2208_v3  ;;  %v702_v38 = vld [vmem:[%s701_s26] sm:$0x1]  ;;  %s1470_s26 = sld [smem:[#allocation3 + $0x302]]  ;;  %s1475_s20 = sld [smem:[#allocation3 + $0x307]] }
  0x3c   :  { %v722_v41 = vrot.slane %v702_v38, 1  ;;  %s825_s17 = scalar_lea.vmem %s2766_s1, %s1463_s28  ;;  %s831_s21 = scalar_lea.vmem %s2766_s1, %s1464_s7 }
  0x3d   :  { %s837_s25 = scalar_lea.vmem %s2766_s1, %s1465_s14  ;;  %s1483_s9 = sld [smem:[#allocation3 + $0x387]] }
  0x3e   :  { %2012 = vmatpush3.bf16.msra.mxu0 %v2289_v13 }
  0x3f   :  { %2013 = vmatprep.subr.bf16.mxu0 %v2208_v3  ;;  %s849_s29 = scalar_lea.vmem %s2766_s1, %s1467_s22  ;;  %s1480_s22 = sld [smem:[#allocation3 + $0x384]] }
  0x41   :  { %s967_s8 = scalar_lea.vmem %s2766_s1, %s1470_s26  ;;  %s991_s26 = scalar_lea.vmem %s2766_s1, %s1474_s16 }
  0x42   :  { %2015 = vmatpush3.bf16.msra.mxu0 %v2301_v16  ;;  %s1478_s16 = sld [smem:[#allocation3 + $0x382]] }
  0x43   :  { %2016 = vmatprep.subr.bf16.mxu0 %v2208_v3 }
  0x46   :  { %2018 = vmatpush3.bf16.msra.mxu0 %v2313_v19 }
  0x47   :  { %2019 = vmatprep.subr.bf16.mxu0 %v2208_v3 }
  0x4a   :  { %2021 = vmatpush3.bf16.msra.mxu0 %v2325_v22 }
  0x4b   :  { %2022 = vmatprep.subr.bf16.mxu0 %v2208_v3 }
  0x4e   :  { %2024 = vmatpush3.bf16.msra.mxu0 %v2337_v25 }
  0x4f   :  { %2049 = vmatprep.subr.bf16.mxu0 %v2208_v3 }
 0x104   :  { %v173_v48 = vpop.f32.mrb[0].mxu0 }
 0x105   :  { %v177_v49 = vadd.f32 %v173_v48, %v106_v47  ;;  %v1672_v50 = vpop.f32.mrb[1].mxu0 }
 0x106   :  { %v518_v50 = vld [vmem:[%s517_s23] sm:$0x1]  ;;  %s1454_s23 = sld [smem:[#allocation3 + $0x202]] }
 0x107   :  { %2173 = vtanh.f32 %v177_v49  ;;  %v556_v52 = vrot.slane %v518_v50, 7  ;;  %v838_v50 = vld [vmem:[%s837_s25] sm:$0x1]  ;;  %s1469_s25 = sld [smem:[#allocation3 + $0x301]] }
 0x108   :  { %v864_v54 = vrot.slane %v838_v50, 3  ;;  %v1261_v50 = vld [vmem:[%s2768_s3 + $0x70] sm:$0xff] }
 0x109   :  { %v576_v56 = vsel %vm93_vm1, %v512_v53, %v556_v52 }
 0x10c   :  { %s671_s30 = scalar_lea.vmem %s2766_s1, %s1454_s23  ;;  %s695_s23 = scalar_lea.vmem %s2766_s1, %s1458_s13 }
 0x10d   :  { %v696_v35 = vld [vmem:[%s695_s23] sm:$0x1]  ;;  %s807_s13 = scalar_lea.vmem %s2766_s1, %s1460_s2  ;;  %s985_s23 = scalar_lea.vmem %s2766_s1, %s1473_s12 }
 0x10e   :  { %v719_v39 = vrot.slane %v696_v35, 2  ;;  %s997_s2 = scalar_lea.vmem %s2766_s1, %s1475_s20 }
 0x111   :  { %v2174_v51 = vpop.eup %2173 }
 0x112   :  { %1706 = vmatmul.mubr.f32.vlgmr.msra.gmra.mrb[0].mxu1 %v2174_v51  ;;  %v524_v51 = vld [vmem:[%s523_s0] sm:$0x1]  ;;  %s1461_s0 = sld [smem:[#allocation3 + $0x281]] }
 0x113   :  { %2027 = vmatpush3.bf16.msra.mxu1 %v2254_v4  ;;  %1775 = vmatprep.mubr.msk.f32.mxu1 %vm2209_vm0, %v2210_v6  ;;  %v559_v55 = vrot.slane %v524_v51, 6 }
 0x114   :  { %2028 = vmatprep.subr.bf16.mxu1 %v2208_v3 }
 0x115   :  { %v577_v59 = vsel %vm95_vm2, %v576_v56, %v559_v55  ;;  %v850_v56 = vld [vmem:[%s849_s29] sm:$0x1]  ;;  %s961_s29 = scalar_lea.vmem %s2766_s1, %s1469_s25  ;;  %s1115_s25 = scalar_lea.vmem %s2766_s1, %s1478_s16 }
 0x116   :  { %v578_v62 = vsel %vm97_vm3, %v577_v59, %v562_v58  ;;  %v870_v59 = vrot.slane %v850_v56, 1  ;;  %v962_v26 = vld [vmem:[%s961_s29] sm:$0x1] }
 0x117   :  { %2030 = vmatpush3.bf16.msra.mxu1 %v2265_v7  ;;  %v579_v1 = vsel %vm99_vm4, %v578_v62, %v565_v61 }
 0x118   :  { %2031 = vmatprep.subr.bf16.mxu1 %v2208_v3  ;;  %v580_v8 = vsel %vm101_vm5, %v579_v1, %v568_v0  ;;  %s813_s6 = scalar_lea.vmem %s2766_s1, %s1461_s0  ;;  %s1468_s0 = sld [smem:[#allocation3 + $0x300]] }
 0x119   :  { %v581_v11 = vsel %vm103_vm6, %v580_v8, %v571_v5  ;;  %v1248_v5 = vld [vmem:[%s2768_s3 + $0x8] sm:$0xff]  ;;  %v1249_v8 = vld [vmem:[%s2768_s3 + $0x10] sm:$0xff] }
 0x11a   :  { %v582_v12 = vsel %vm105_vm7, %v581_v11, %v574_v9  ;;  %v2146_v9 = vpack.c.bf16 %v1248_v5, %v1247_v2  ;;  %v1250_v11 = vld [vmem:[%s2768_s3 + $0x18] sm:$0xff] }
 0x11b   :  { %2033 = vmatpush3.bf16.msra.mxu1 %v2277_v10 }
 0x11c   :  { %2034 = vmatprep.subr.bf16.mxu1 %v2208_v3 }
 0x11e   :  { %s955_s11 = scalar_lea.vmem %s2766_s1, %s1468_s0 }
 0x11f   :  { %2036 = vmatpush3.bf16.msra.mxu1 %v2289_v13  ;;  %v956_v29 = vld [vmem:[%s955_s11] sm:$0x1] }
 0x120   :  { %2037 = vmatprep.subr.bf16.mxu1 %v2208_v3 }
 0x123   :  { %2039 = vmatpush3.bf16.msra.mxu1 %v2301_v16 }
 0x124   :  { %2040 = vmatprep.subr.bf16.mxu1 %v2208_v3 }
 0x127   :  { %2042 = vmatpush3.bf16.msra.mxu1 %v2313_v19 }
 0x128   :  { %2043 = vmatprep.subr.bf16.mxu1 %v2208_v3 }
 0x12b   :  { %2045 = vmatpush3.bf16.msra.mxu1 %v2325_v22 }
 0x12c   :  { %2046 = vmatprep.subr.bf16.mxu1 %v2208_v3 }
 0x12f   :  { %2048 = vmatpush3.bf16.msra.mxu1 %v2337_v25 }
 0x130   :  { %2073 = vmatprep.subr.bf16.mxu1 %v2208_v3 }
 0x1e5   :  { %v353_v17 = vpop.f32.mrb[0].mxu1 }
 0x1e6   :  { %v357_v18 = vadd.f32 %v353_v17, %v286_v15  ;;  %v1707_v20 = vpop.f32.mrb[1].mxu1 }
 0x1e7   :  { %v666_v20 = vld [vmem:[%s665_s27] sm:$0x1]  ;;  %s1462_s27 = sld [smem:[#allocation3 + $0x282]] }
 0x1e8   :  { %2175 = vtanh.f32 %v357_v18  ;;  %v704_v23 = vrot.slane %v666_v20, 7 }
 0x1ea   :  { %v724_v28 = vsel %vm93_vm1, %v660_v24, %v704_v23  ;;  %v1256_v23 = vld [vmem:[%s2768_s3 + $0x48] sm:$0xff] }
 0x1ed   :  { %s819_s10 = scalar_lea.vmem %s2766_s1, %s1462_s27  ;;  %s843_s27 = scalar_lea.vmem %s2766_s1, %s1466_s18 }
 0x1ee   :  { %v844_v53 = vld [vmem:[%s843_s27] sm:$0x1]  ;;  %s1471_s27 = sld [smem:[#allocation3 + $0x303]] }
 0x1ef   :  { %v867_v57 = vrot.slane %v844_v53, 2  ;;  %s1479_s18 = sld [smem:[#allocation3 + $0x383]] }
 0x1f2   :  { %v2176_v21 = vpop.eup %2175 }
 0x1f3   :  { %1741 = vmatmul.mubr.f32.vlgmr.msra.gmra.mrb[2].mxu0 %v2176_v21  ;;  %v672_v21 = vld [vmem:[%s671_s30] sm:$0x1]  ;;  %s1472_s30 = sld [smem:[#allocation3 + $0x304]] }
 0x1f4   :  { %2051 = vmatpush3.bf16.msra.mxu0 %v2254_v4  ;;  %1810 = vmatprep.mubr.msk.f32.mxu0 %vm2209_vm0, %v2210_v6  ;;  %v707_v27 = vrot.slane %v672_v21, 6  ;;  %v1255_v21 = vld [vmem:[%s2768_s3 + $0x40] sm:$0xff]  ;;  %s973_s15 = scalar_lea.vmem %s2766_s1, %s1471_s27  ;;  %s1481_s27 = sld [smem:[#allocation3 + $0x385]] }
 0x1f5   :  { %2052 = vmatprep.subr.bf16.mxu0 %v2208_v3  ;;  %v2158_v24 = vpack.c.bf16 %v1256_v23, %v1255_v21  ;;  %s1121_s29 = scalar_lea.vmem %s2766_s1, %s1479_s18  ;;  %s1145_s18 = scalar_lea.vmem %s2766_s1, %s1483_s9  ;;  %v1484_v21 = vld [vmem:[%s2769_s4] ss:$0 sm:$0xff] }
 0x1f6   :  { %v725_v31 = vsel %vm95_vm2, %v724_v28, %v707_v27  ;;  %v968_v27 = vld [vmem:[%s967_s8] sm:$0x1]  ;;  %v1000_v28 = vrot.slane %v962_v26, 7  ;;  %s1127_s8 = scalar_lea.vmem %s2766_s1, %s1480_s22 }
 0x1f7   :  { %v726_v34 = vsel %vm97_vm3, %v725_v31, %v710_v30  ;;  %v974_v30 = vld [vmem:[%s973_s15] sm:$0x1]  ;;  %v1003_v31 = vrot.slane %v968_v27, 6  ;;  %s1477_s15 = sld [smem:[#allocation3 + $0x381]] }
 0x1f8   :  { %2054 = vmatpush3.bf16.msra.mxu0 %v2265_v7  ;;  %v727_v37 = vsel %vm99_vm4, %v726_v34, %v713_v33  ;;  %v1020_v32 = vsel %vm93_vm1, %v956_v29, %v1000_v28  ;;  %v1006_v34 = vrot.slane %v974_v30, 5  ;;  %v1122_v56 = vld [vmem:[%s1121_s29] sm:$0x1] }
 0x1f9   :  { %2055 = vmatprep.subr.bf16.mxu0 %v2208_v3  ;;  %v728_v40 = vsel %vm101_vm5, %v727_v37, %v716_v36  ;;  %s979_s19 = scalar_lea.vmem %s2766_s1, %s1472_s30  ;;  %v1021_v35 = vsel %vm95_vm2, %v1020_v32, %v1003_v31  ;;  %v986_v36 = vld [vmem:[%s985_s23] sm:$0x1]  ;;  %s1482_s30 = sld [smem:[#allocation3 + $0x386]] }
 0x1fa   :  { %v729_v42 = vsel %vm103_vm6, %v728_v40, %v719_v39  ;;  %v980_v33 = vld [vmem:[%s979_s19] sm:$0x1]  ;;  %v1022_v38 = vsel %vm97_vm3, %v1021_v35, %v1006_v34  ;;  %v1012_v40 = vrot.slane %v986_v36, 3  ;;  %s1133_s12 = scalar_lea.vmem %s2766_s1, %s1481_s27 }
 0x1fb   :  { %v730_v43 = vsel %vm105_vm7, %v729_v42, %v722_v41  ;;  %v1009_v37 = vrot.slane %v980_v33, 4  ;;  %v992_v39 = vld [vmem:[%s991_s26] sm:$0x1] }
 0x1fc   :  { %2057 = vmatpush3.bf16.msra.mxu0 %v2277_v10  ;;  %v998_v42 = vld [vmem:[%s997_s2] sm:$0x1] }
 0x1fd   :  { %2058 = vmatprep.subr.bf16.mxu0 %v2208_v3  ;;  %v1023_v41 = vsel %vm99_vm4, %v1022_v38, %v1009_v37 }
 0x200   :  { %2060 = vmatpush3.bf16.msra.mxu0 %v2289_v13 }
 0x201   :  { %2061 = vmatprep.subr.bf16.mxu0 %v2208_v3 }
 0x204   :  { %2063 = vmatpush3.bf16.msra.mxu0 %v2301_v16 }
 0x205   :  { %2064 = vmatprep.subr.bf16.mxu0 %v2208_v3 }
 0x208   :  { %2066 = vmatpush3.bf16.msra.mxu0 %v2313_v19 }
 0x209   :  { %2067 = vmatprep.subr.bf16.mxu0 %v2208_v3 }
 0x20c   :  { %2069 = vmatpush3.bf16.msra.mxu0 %v2325_v22 }
 0x20d   :  { %2070 = vmatprep.subr.bf16.mxu0 %v2208_v3 }
 0x210   :  { %2072 = vmatpush3.bf16.msra.mxu0 %v2337_v25 }
 0x211   :  { %2097 = vmatprep.subr.bf16.mxu0 %v2208_v3 }
 0x2c6   :  { %v501_v46 = vpop.f32.mrb[2].mxu0 }
 0x2c7   :  { %v505_v47 = vadd.f32 %v501_v46, %v434_v45  ;;  %v1742_v48 = vpop.f32.mrb[3].mxu0 }
 0x2c9   :  { %2177 = vtanh.f32 %v505_v47 }
 0x2d3   :  { %v2178_v49 = vpop.eup %2177 }
 0x2d4   :  { %1776 = vmatmul.mubr.f32.vlgmr.msra.gmra.mrb[2].mxu1 %v2178_v49 }
 0x2d5   :  { %2075 = vmatpush3.bf16.msra.mxu1 %v2254_v4  ;;  %1845 = vmatprep.mubr.msk.f32.mxu1 %vm2209_vm0, %v2210_v6 }
 0x2d6   :  { %2076 = vmatprep.subr.bf16.mxu1 %v2208_v3 }
 0x2d9   :  { %2078 = vmatpush3.bf16.msra.mxu1 %v2265_v7 }
 0x2da   :  { %2079 = vmatprep.subr.bf16.mxu1 %v2208_v3 }
 0x2dd   :  { %2081 = vmatpush3.bf16.msra.mxu1 %v2277_v10 }
 0x2de   :  { %2082 = vmatprep.subr.bf16.mxu1 %v2208_v3 }
 0x2e1   :  { %2084 = vmatpush3.bf16.msra.mxu1 %v2289_v13 }
 0x2e2   :  { %2085 = vmatprep.subr.bf16.mxu1 %v2208_v3 }
 0x2e5   :  { %2087 = vmatpush3.bf16.msra.mxu1 %v2301_v16 }
 0x2e6   :  { %2088 = vmatprep.subr.bf16.mxu1 %v2208_v3 }
 0x2e9   :  { %2090 = vmatpush3.bf16.msra.mxu1 %v2313_v19 }
 0x2ea   :  { %2091 = vmatprep.subr.bf16.mxu1 %v2208_v3 }
 0x2ed   :  { %2093 = vmatpush3.bf16.msra.mxu1 %v2325_v22 }
 0x2ee   :  { %2094 = vmatprep.subr.bf16.mxu1 %v2208_v3 }
 0x2f1   :  { %2096 = vmatpush3.bf16.msra.mxu1 %v2337_v25 }
 0x2f2   :  { %2121 = vmatprep.subr.bf16.mxu1 %v2208_v3 }
 0x3a7   :  { %v649_v14 = vpop.f32.mrb[2].mxu1 }
 0x3a8   :  { %v653_v15 = vadd.f32 %v649_v14, %v582_v12  ;;  %v1777_v17 = vpop.f32.mrb[3].mxu1  ;;  %v2149_v12 = vpack.c.bf16 %v1250_v11, %v1249_v8  ;;  %v1252_v14 = vld [vmem:[%s2768_s3 + $0x28] sm:$0xff]  ;;  %v1146_v8 = vld [vmem:[%s1145_s18] sm:$0x1] }
 0x3a9   :  { %v1253_v17 = vld [vmem:[%s2768_s3 + $0x30] sm:$0xff] }
 0x3aa   :  { %2179 = vtanh.f32 %v653_v15 }
 0x3b4   :  { %v2180_v18 = vpop.eup %2179 }
 0x3b5   :  { %1811 = vmatmul.mubr.f32.vlgmr.msra.gmra.mrb[4].mxu0 %v2180_v18  ;;  %v1254_v18 = vld [vmem:[%s2768_s3 + $0x38] sm:$0xff] }
 0x3b6   :  { %2099 = vmatpush3.bf16.msra.mxu0 %v2254_v4  ;;  %1880 = vmatprep.mubr.msk.f32.mxu0 %vm2209_vm0, %v2210_v6  ;;  %v2155_v20 = vpack.c.bf16 %v1254_v18, %v1253_v17 }
 0x3b7   :  { %2100 = vmatprep.subr.bf16.mxu0 %v2208_v3 }
 0x3ba   :  { %2102 = vmatpush3.bf16.msra.mxu0 %v2265_v7 }
 0x3bb   :  { %2103 = vmatprep.subr.bf16.mxu0 %v2208_v3 }
 0x3be   :  { %2105 = vmatpush3.bf16.msra.mxu0 %v2277_v10 }
 0x3bf   :  { %2106 = vmatprep.subr.bf16.mxu0 %v2208_v3 }
 0x3c2   :  { %2108 = vmatpush3.bf16.msra.mxu0 %v2289_v13 }
 0x3c3   :  { %2109 = vmatprep.subr.bf16.mxu0 %v2208_v3 }
 0x3c6   :  { %2111 = vmatpush3.bf16.msra.mxu0 %v2301_v16 }
 0x3c7   :  { %2112 = vmatprep.subr.bf16.mxu0 %v2208_v3 }
 0x3ca   :  { %2114 = vmatpush3.bf16.msra.mxu0 %v2313_v19 }
 0x3cb   :  { %2115 = vmatprep.subr.bf16.mxu0 %v2208_v3 }
 0x3ce   :  { %2117 = vmatpush3.bf16.msra.mxu0 %v2325_v22 }
 0x3cf   :  { %2118 = vmatprep.subr.bf16.mxu0 %v2208_v3 }
 0x3d2   :  { %2120 = vmatpush3.bf16.msra.mxu0 %v2337_v25 }
 0x3d3   :  { %2145 = vmatprep.subr.bf16.mxu0 %v2208_v3 }
 0x488   :  { %v797_v44 = vpop.f32.mrb[4].mxu0 }
 0x489   :  { %v801_v45 = vadd.f32 %v797_v44, %v730_v43  ;;  %v1812_v46 = vpop.f32.mrb[5].mxu0  ;;  %v1015_v43 = vrot.slane %v992_v39, 2  ;;  %v1024_v44 = vsel %vm101_vm5, %v1023_v41, %v1012_v40 }
 0x48b   :  { %2181 = vtanh.f32 %v801_v45  ;;  %v1018_v45 = vrot.slane %v998_v42, 1  ;;  %v1025_v46 = vsel %vm103_vm6, %v1024_v44, %v1015_v43 }
 0x495   :  { %v2182_v47 = vpop.eup %2181 }
 0x496   :  { %1846 = vmatmul.mubr.f32.vlgmr.msra.gmra.mrb[4].mxu1 %v2182_v47  ;;  %v1026_v47 = vsel %vm105_vm7, %v1025_v46, %v1018_v45 }
 0x497   :  { %2123 = vmatpush3.bf16.msra.mxu1 %v2254_v4  ;;  %1915 = vmatprep.mubr.msk.f32.mxu1 %vm2209_vm0, %v2210_v6  ;;  %v814_v4 = vld [vmem:[%s813_s6] sm:$0x1] }
 0x498   :  { %2124 = vmatprep.subr.bf16.mxu1 %v2208_v3 }
 0x49b   :  { %2126 = vmatpush3.bf16.msra.mxu1 %v2265_v7  ;;  %v820_v7 = vld [vmem:[%s819_s10] sm:$0x1] }
 0x49c   :  { %2127 = vmatprep.subr.bf16.mxu1 %v2208_v3 }
 0x49f   :  { %2129 = vmatpush3.bf16.msra.mxu1 %v2277_v10  ;;  %v852_v10 = vrot.slane %v814_v4, 7 }
 0x4a0   :  { %2130 = vmatprep.subr.bf16.mxu1 %v2208_v3 }
 0x4a3   :  { %2132 = vmatpush3.bf16.msra.mxu1 %v2289_v13  ;;  %v808_v13 = vld [vmem:[%s807_s13] sm:$0x1] }
 0x4a4   :  { %2133 = vmatprep.subr.bf16.mxu1 %v2208_v3 }
 0x4a7   :  { %2135 = vmatpush3.bf16.msra.mxu1 %v2301_v16  ;;  %v826_v16 = vld [vmem:[%s825_s17] sm:$0x1]  ;;  %s1476_s17 = sld [smem:[#allocation3 + $0x380]] }
 0x4a8   :  { %2136 = vmatprep.subr.bf16.mxu1 %v2208_v3  ;;  %v858_v48 = vrot.slane %v826_v16, 5  ;;  %v1257_v16 = vld [vmem:[%s2768_s3 + $0x50] sm:$0xff] }
 0x4ab   :  { %2138 = vmatpush3.bf16.msra.mxu1 %v2313_v19  ;;  %v855_v19 = vrot.slane %v820_v7, 6 }
 0x4ac   :  { %2139 = vmatprep.subr.bf16.mxu1 %v2208_v3 }
 0x4ad   :  { %s1103_s0 = scalar_lea.vmem %s2766_s1, %s1476_s17 }
 0x4af   :  { %2141 = vmatpush3.bf16.msra.mxu1 %v2325_v22  ;;  %v872_v22 = vsel %vm93_vm1, %v808_v13, %v852_v10 }
 0x4b0   :  { %2142 = vmatprep.subr.bf16.mxu1 %v2208_v3  ;;  %v873_v49 = vsel %vm95_vm2, %v872_v22, %v855_v19  ;;  %v1258_v19 = vld [vmem:[%s2768_s3 + $0x58] sm:$0xff] }
 0x4b1   :  { %v874_v52 = vsel %vm97_vm3, %v873_v49, %v858_v48  ;;  %v2161_v22 = vpack.c.bf16 %v1258_v19, %v1257_v16  ;;  %v1260_v48 = vld [vmem:[%s2768_s3 + $0x68] sm:$0xff] }
 0x4b3   :  { %2144 = vmatpush3.bf16.msra.mxu1 %v2337_v25  ;;  %v832_v25 = vld [vmem:[%s831_s21] sm:$0x1]  ;;  %s1109_s21 = scalar_lea.vmem %s2766_s1, %s1477_s15  ;;  %s1139_s15 = scalar_lea.vmem %s2766_s1, %s1482_s30 }
 0x4b4   :  { %v861_v51 = vrot.slane %v832_v25, 4  ;;  %v1259_v25 = vld [vmem:[%s2768_s3 + $0x60] sm:$0xff] }
 0x4b5   :  { %v2164_v49 = vpack.c.bf16 %v1260_v48, %v1259_v25  ;;  %v1110_v53 = vld [vmem:[%s1109_s21] sm:$0x1] }
 0x4b6   :  { %v875_v55 = vsel %vm99_vm4, %v874_v52, %v861_v51  ;;  %v1262_v51 = vld [vmem:[%s2768_s3 + $0x78] sm:$0xff] }
 0x4b7   :  { %v876_v58 = vsel %vm101_vm5, %v875_v55, %v864_v54  ;;  %v2167_v52 = vpack.c.bf16 %v1262_v51, %v1261_v50  ;;  %v1148_v54 = vrot.slane %v1110_v53, 7  ;;  %v1104_v55 = vld [vmem:[%s1103_s0] sm:$0x1] }
 0x4b8   :  { %v877_v60 = vsel %vm103_vm6, %v876_v58, %v867_v57 }
 0x4b9   :  { %v878_v61 = vsel %vm105_vm7, %v877_v60, %v870_v59  ;;  %v1168_v58 = vsel %vm93_vm1, %v1104_v55, %v1148_v54  ;;  %v1128_v59 = vld [vmem:[%s1127_s8] sm:$0x1]  ;;  %v1154_v60 = vrot.slane %v1122_v56, 5 }
 0x569   :  { %v945_v62 = vpop.f32.mrb[4].mxu1 }
 0x56a   :  { %v949_v63 = vadd.f32 %v945_v62, %v878_v61  ;;  %v1847_v0 = vpop.f32.mrb[5].mxu1  ;;  %v1134_v62 = vld [vmem:[%s1133_s12] sm:$0x1] }
 0x56b   :  { %v1160_v2 = vrot.slane %v1134_v62, 3 }
 0x56c   :  { %2183 = vtanh.f32 %v949_v63  ;;  %v1157_v63 = vrot.slane %v1128_v59, 4 }
 0x576   :  { %v2184_v1 = vpop.eup %2183 }
 0x577   :  { %1881 = vmatmul.mubr.f32.vlgmr.msra.gmra.mrb[6].mxu0 %v2184_v1  ;;  %v1140_v1 = vld [vmem:[%s1139_s15] sm:$0x1] }
 0x578   :  { %1950 = vmatprep.mubr.msk.f32.mxu0 %vm2209_vm0, %v2210_v6  ;;  %2147 = vmatpush3.bf16.msra.mxu0 %v2146_v9  ;;  %v1251_v6 = vld [vmem:[%s2768_s3 + $0x20] sm:$0xff]  ;;  %v1163_v9 = vrot.slane %v1140_v1, 2 }
 0x579   :  { %2148 = vmatprep.subr.bf16.mxu0 %v2208_v3  ;;  %v2152_v15 = vpack.c.bf16 %v1252_v14, %v1251_v6 }
 0x57c   :  { %2150 = vmatpush3.bf16.msra.mxu0 %v2149_v12  ;;  %v1166_v12 = vrot.slane %v1146_v8, 1 }
 0x57d   :  { %2151 = vmatprep.subr.bf16.mxu0 %v2208_v3 }
 0x580   :  { %2153 = vmatpush3.bf16.msra.mxu0 %v2152_v15 }
 0x581   :  { %2154 = vmatprep.subr.bf16.mxu0 %v2208_v3 }
 0x584   :  { %2156 = vmatpush3.bf16.msra.mxu0 %v2155_v20 }
 0x585   :  { %2157 = vmatprep.subr.bf16.mxu0 %v2208_v3 }
 0x588   :  { %2159 = vmatpush3.bf16.msra.mxu0 %v2158_v24 }
 0x589   :  { %2160 = vmatprep.subr.bf16.mxu0 %v2208_v3 }
 0x58c   :  { %2162 = vmatpush3.bf16.msra.mxu0 %v2161_v22 }
 0x58d   :  { %2163 = vmatprep.subr.bf16.mxu0 %v2208_v3 }
 0x590   :  { %2165 = vmatpush3.bf16.msra.mxu0 %v2164_v49 }
 0x591   :  { %2166 = vmatprep.subr.bf16.mxu0 %v2208_v3  ;;  %v1116_v3 = vld [vmem:[%s1115_s25] sm:$0x1] }
 0x592   :  { %v1151_v57 = vrot.slane %v1116_v3, 6 }
 0x594   :  { %2168 = vmatpush3.bf16.msra.mxu0 %v2167_v52  ;;  %v1169_v61 = vsel %vm95_vm2, %v1168_v58, %v1151_v57 }
 0x595   :  { %v1170_v0 = vsel %vm97_vm3, %v1169_v61, %v1154_v60 }
 0x596   :  { %v1171_v5 = vsel %vm99_vm4, %v1170_v0, %v1157_v63 }
 0x597   :  { %v1172_v11 = vsel %vm101_vm5, %v1171_v5, %v1160_v2 }
 0x598   :  { %v1173_v6 = vsel %vm103_vm6, %v1172_v11, %v1163_v9 }
 0x599   :  { %v1174_v14 = vsel %vm105_vm7, %v1173_v6, %v1166_v12 }
 0x64a   :  { %v1093_v4 = vpop.f32.mrb[6].mxu0 }
 0x64b   :  { %v1097_v7 = vadd.f32 %v1093_v4, %v1026_v47  ;;  %v1882_v10 = vpop.f32.mrb[7].mxu0 }
 0x64d   :  { %2185 = vtanh.f32 %v1097_v7 }
 0x657   :  { %v2186_v13 = vpop.eup %2185 }
 0x658   :  { %1916 = vmatmul.mubr.f32.vlgmr.msra.gmra.mrb[6].mxu1 %v2186_v13 }
 0x72b   :  { %v1241_v15 = vpop.f32.mrb[6].mxu1 }
 0x72c   :  { %v1245_v17 = vadd.f32 %v1241_v15, %v1174_v14  ;;  %v1917_v18 = vpop.f32.mrb[7].mxu1 }
 0x72e   :  { %2187 = vtanh.f32 %v1245_v17 }
 0x738   :  { %v2188_v20 = vpop.eup %2187 }
 0x739   :  { %1951 = vmatmul.mubr.f32.vlgmr.msra.gmra.mrb[8].mxu0 %v2188_v20 }
 0x80c   :  { %v1336_v23 = vpop.f32.mrb[8].mxu0 }
 0x80d   :  { %v1337_v24 = vadd.f32 %v1484_v21, %v1336_v23  ;;  %v1952_v26 = vpop.f32.mrb[9].mxu0 }
 0x80f   :  { %1340 = vmax.xlane.f32.xlu0 %v1337_v24 }
 0x89c   :  { %v1341_v27 = vpop.xlane.xlu0 %1340 }
 0x89d   :  { %v1342_v28 = vsub.f32 %v1337_v24, %v1341_v27 }
 0x89f   :  { %v1343_v29 = vmul.f32 1.442695, %v1342_v28 }
 0x8a1   :  { %2189 = vpow2.f32 %v1343_v29 }
 0x8ab   :  { %v2190_v30 = vpop.eup %2189 }
 0x8ac   :  { %1345 = vadd.xlane.f32.xlu0 %v2190_v30 }
 0x939   :  { %v1346_v31 = vpop.xlane.xlu0 %1345 }
 0x93a   :  { %2191 = vrcp.f32 %v1346_v31 }
 0x944   :  { %v2192_v32 = vpop.eup %2191 }
 0x945   :  { %v1348_v33 = vmul.f32 %v2192_v32, %v1346_v31 }
 0x947   :  { %v1349_v34 = vsub.f32 2.0, %v1348_v33 }
 0x949   :  { %v1350_v35 = vmul.f32 %v2192_v32, %v1349_v34 }
 0x94b   :  { %v1351_v36 = vmul.f32 %v2190_v30, %v1350_v35 }
 0x94d   :  { %1352 = vst [vmem:[%s2770_s5] sm:$0xff] %v1351_v36 }

</bundles_post_ra>
